<compile_context>
chip_gen: v7x
topology: tpu7x:2x2x1
jax: 0.10.0
libtpu: 0.0.40
codegen_flags: <defaults>
</compile_context>

<pallas_src>
import jax
import jax.numpy as jnp
import numpy as np
from jax.experimental import pallas as pl
from jax.experimental.pallas import tpu as pltpu

# ----------------------------- model dimensions ------------------------------
NUM_HOPS = 3     # num_hops
NUM_FEATS = 4    # num_feats (NARS relation subsets)
NFEAT = 32       # nfeat
HIDDEN = 32      # hidden
NCLASS = 16      # nclass
N_NODES = 128    # number of nodes
KIN = NUM_FEATS * NFEAT          # folded input width = 128 (lane-dense)
OUT_PAD = 128                    # padded output width for lane-dense stores


def _prelu(x, a):
    # nn.PReLU with a single learnable parameter `a`
    return jnp.where(x >= 0, x, a * x)


# --------------------------------- kernel ------------------------------------
def nars_jk_gamlp_kernel(
    scalars_ref,           # SMEM (H+2,): [process PReLU a_h ..., model PReLU a, lr_att bias]
    feats_ref,             # VMEM (H, TN, KIN) bf16   (WeightedAggregator folded into w1f)
    label_ref,             # VMEM (TN, NCLASS) f32
    w1f_ref, b1_ref,       # VMEM (H, KIN, HIDDEN) bf16, (H, HIDDEN) f32   process[i] layer 1
    w2_ref, b2_ref,        # VMEM (H, HIDDEN, HIDDEN), (H, HIDDEN)         process[i] layer 2
    wjk_ref, bjk_ref,      # VMEM (H*HIDDEN, HIDDEN), (1, HIDDEN)          lr_jk_ref
    watt_jk_ref,           # VMEM (1, HIDDEN)   lr_att weight, jk half
    watt_x_ref,            # VMEM (1, HIDDEN)   lr_att weight, x half
    whead_ref, bhead_ref,  # VMEM (HIDDEN+NCLASS, OUT_PAD), (1, OUT_PAD)   fused lr_output+label_fc
    out_ref,               # VMEM (TN, OUT_PAD)
):
    H = NUM_HOPS

    # --- per-hop 2-layer FeedForwardNet (aggregator folded into layer 1) ---
    hop_hidden = []
    for h in range(H):
        h1 = jnp.dot(feats_ref[h], w1f_ref[h], preferred_element_type=jnp.float32)
        h1 = _prelu(h1 + b1_ref[h:h + 1, :], scalars_ref[h])      # dropout = identity (eval)
        h2 = jnp.dot(h1, w2_ref[h], preferred_element_type=jnp.float32) + b2_ref[h:h + 1, :]
        hop_hidden.append(h2)                                     # (TN, HIDDEN)

    # --- jk_ref = PReLU(lr_jk_ref(concat(inputs))): one (TN, H*HIDDEN) matmul ---
    slab = jnp.concatenate(hop_hidden, axis=-1)                   # (TN, H*HIDDEN)
    jk = jnp.dot(slab, wjk_ref[...], preferred_element_type=jnp.float32) + bjk_ref[0:1, :]
    jk = _prelu(jk, scalars_ref[H])

    # --- attention scores: relu(lr_att(cat(jk, x_h))) via VPU mul + lane reduce ---
    b_att = scalars_ref[H + 1]
    w_jk_row = watt_jk_ref[...]                                   # (1, HIDDEN)
    w_x_row = watt_x_ref[...]                                     # (1, HIDDEN)
    jk_score = jnp.sum(jk * w_jk_row, axis=-1, keepdims=True)     # (TN, 1)
    scores = []
    for h in range(H):
        s = jk_score + jnp.sum(hop_hidden[h] * w_x_row, axis=-1, keepdims=True) + b_att
        scores.append(jnp.maximum(s, 0.0))                        # act='relu'

    # softmax over the hop axis (list form avoids tiny-lane concat)
    m = scores[0]
    for h in range(1, H):
        m = jnp.maximum(m, scores[h])
    exps = [jnp.exp(s - m) for s in scores]
    denom = exps[0]
    for h in range(1, H):
        denom = denom + exps[h]
    inv = pl.reciprocal(denom, approx=True)                       # EUP reciprocal

    # --- attention-weighted combination (att_drop = identity) ---
    right = hop_hidden[0] * (exps[0] * inv)
    for h in range(1, H):
        right = right + hop_hidden[h] * (exps[h] * inv)           # (TN, HIDDEN)

    # --- fused output heads (lr_output + label_fc), lane-dense 128-wide store ---
    head_in = jnp.concatenate([right, label_ref[...]], axis=-1)   # (TN, HIDDEN+NCLASS)
    out_ref[...] = (jnp.dot(head_in, whead_ref[...], preferred_element_type=jnp.float32)
                    + bhead_ref[0:1, :])


# -------------------------------- wrapper -------------------------------------
def _full_spec(shape):
    n = len(shape)
    return pl.BlockSpec(shape, lambda i, _n=n: (0,) * _n)


def _choose_tile_n(n):
    # v7x has 2 TensorCores: keep the parallel grid even (>=2 steps) when possible so
    # the node axis shards across both cores; otherwise take one fat tile (the kernel is
    # overhead-bound on single-TC v5e/v6e and uses <1 MiB of VMEM per step).
    half = n // 2
    if n % 2 == 0 and half % 8 == 0:
        return half
    return n


@jax.jit
def nars_jk_gamlp_forward(feats, label_emb, params):
    H, n, F, D = feats.shape
    assert (H, F, D) == (NUM_HOPS, NUM_FEATS, NFEAT)

    # ---- wrapper-side preprocessing (cheap XLA plumbing, done once per call) ----
    # lane-dense feats: (H, N, F*D = 128), bf16 for halved HBM traffic on the only
    # per-step input that scales with N.
    feats_flat = feats.reshape(H, n, KIN).astype(jnp.bfloat16)
    # fold WeightedAggregator into the first process Linear:
    #   (sum_f agg_w[h,f,d] * x[n,f,d]) @ w1[h]  ==  x_flat[n, f*D+d] @ w1f[h, f*D+d, :]
    w1f = (params["agg_w"][:, :, :, None] * params["w1"][:, None, :, :]).reshape(H, KIN, HIDDEN)
    w1f = w1f.astype(jnp.bfloat16)
    # lr_att weight split into jk / x rows for the VPU-reduce score path
    watt_jk = params["watt"][:HIDDEN, 0].reshape(1, HIDDEN)
    watt_x = params["watt"][HIDDEN:, 0].reshape(1, HIDDEN)
    # fused, 128-wide padded output head: [right | label_emb] @ whead + bhead
    whead = jnp.zeros((HIDDEN + NCLASS, OUT_PAD), jnp.float32)
    whead = whead.at[:HIDDEN, :NCLASS].set(params["wout"])
    whead = whead.at[HIDDEN:, :NCLASS].set(params["wlab"])
    bhead = jnp.zeros((1, OUT_PAD), jnp.float32)
    bhead = bhead.at[:, :NCLASS].set(params["bout"] + params["blab"])

    tile_n = _choose_tile_n(n)
    assert n % tile_n == 0, "node count must divide the chosen tile"
    grid = (n // tile_n,)

    in_specs = [
        pl.BlockSpec(memory_space=pltpu.MemorySpace.SMEM),                   # scalars
        pl.BlockSpec((NUM_HOPS, tile_n, KIN), lambda i: (0, i, 0)),          # feats_flat
        pl.BlockSpec((tile_n, NCLASS), lambda i: (i, 0)),                    # label_emb
        _full_spec((NUM_HOPS, KIN, HIDDEN)), _full_spec((NUM_HOPS, HIDDEN)),       # w1f, b1
        _full_spec((NUM_HOPS, HIDDEN, HIDDEN)), _full_spec((NUM_HOPS, HIDDEN)),    # w2, b2
        _full_spec((NUM_HOPS * HIDDEN, HIDDEN)), _full_spec((1, HIDDEN)),          # wjk, bjk
        _full_spec((1, HIDDEN)), _full_spec((1, HIDDEN)),                          # watt_jk, watt_x
        _full_spec((HIDDEN + NCLASS, OUT_PAD)), _full_spec((1, OUT_PAD)),          # whead, bhead
    ]

    out_pad = pl.pallas_call(
        nars_jk_gamlp_kernel,
        out_shape=jax.ShapeDtypeStruct((n, OUT_PAD), jnp.float32),
        grid=grid,
        in_specs=in_specs,
        out_specs=pl.BlockSpec((tile_n, OUT_PAD), lambda i: (i, 0)),
        compiler_params=pltpu.CompilerParams(dimension_semantics=("parallel",)),
    )(
        params["scalars"], feats_flat, label_emb,
        w1f, params["b1"],
        params["w2"], params["b2"],
        params["wjk"], params["bjk"],
        watt_jk, watt_x,
        whead, bhead,
    )
    return out_pad[:, :NCLASS]


# ----------------------------- pure-JAX reference -----------------------------
def reference(feats, label_emb, p):
    H = NUM_HOPS
    inputs = []
    for h in range(H):
        agg = jnp.sum(feats[h] * p["agg_w"][h][None], axis=1)
        h1 = agg @ p["w1"][h] + p["b1"][h]
        h1 = _prelu(h1, p["scalars"][h])
        inputs.append(h1 @ p["w2"][h] + p["b2"][h])
    concat = jnp.concatenate(inputs, axis=1)
    jk = concat @ p["wjk"] + p["bjk"][0]
    jk = _prelu(jk, p["scalars"][H])
    scores = []
    for h in range(H):
        cat = jnp.concatenate([jk, inputs[h]], axis=1)
        scores.append(jax.nn.relu(cat @ p["watt"] + p["scalars"][H + 1]))
    W = jax.nn.softmax(jnp.concatenate(scores, axis=1), axis=1)
    right = sum(inputs[h] * W[:, h:h + 1] for h in range(H))
    out = right @ p["wout"] + p["bout"][0]
    out = out + label_emb @ p["wlab"] + p["blab"][0]
    return out


# --------------------------------- main ---------------------------------------
if __name__ == "__main__":
    key = jax.random.PRNGKey(0)
    keys = jax.random.split(key, 16)

    def nrm(k, shape, scale=0.1):
        return scale * jax.random.normal(k, shape, dtype=jnp.float32)

    # deterministic synthetic parameters (shapes from the module __init__)
    params = {
        "agg_w": nrm(keys[0], (NUM_HOPS, NUM_FEATS, NFEAT)),
        "w1":    nrm(keys[1], (NUM_HOPS, NFEAT, HIDDEN)),
        "b1":    nrm(keys[2], (NUM_HOPS, HIDDEN)),
        "w2":    nrm(keys[3], (NUM_HOPS, HIDDEN, HIDDEN)),
        "b2":    nrm(keys[4], (NUM_HOPS, HIDDEN)),
        "wjk":   nrm(keys[5], (NUM_HOPS * HIDDEN, HIDDEN)),
        "bjk":   nrm(keys[6], (1, HIDDEN)),
        "watt":  nrm(keys[7], (2 * HIDDEN, 1)),
        "wout":  nrm(keys[8], (HIDDEN, NCLASS)),
        "bout":  nrm(keys[9], (1, NCLASS)),
        "wlab":  nrm(keys[10], (NCLASS, NCLASS)),
        "blab":  nrm(keys[11], (1, NCLASS)),
        # [process PReLU a (per hop), model PReLU a, lr_att bias]
        "scalars": jnp.concatenate([
            jnp.full((NUM_HOPS,), 0.25, jnp.float32),   # process PReLU init
            jnp.array([0.25], jnp.float32),             # model PReLU init
            jnp.array([0.05], jnp.float32),             # lr_att bias
        ]),
    }

    # inputs: list-of-hop NARS features stacked -> (H, N, F, NFEAT); label embedding
    feats = nrm(keys[12], (NUM_HOPS, N_NODES, NUM_FEATS, NFEAT), scale=1.0)
    label_emb = nrm(keys[13], (N_NODES, NCLASS), scale=1.0)

    out = nars_jk_gamlp_forward(feats, label_emb, params)
    out = jax.block_until_ready(out)

    ref = reference(feats, label_emb, params)
    np.testing.assert_allclose(np.asarray(out), np.asarray(ref), rtol=5e-2, atol=5e-2)

    print("KERNEL_OK")
</pallas_src>

<mosaic_0001>
module attributes {stable_mosaic.version = 11 : i64} {
  func.func @nars_jk_gamlp_kernel(%arg0: i32, %arg1: memref<5xf32, #tpu.memory_space<smem>>, %arg2: memref<3x64x128xbf16, #tpu.memory_space<vmem>>, %arg3: memref<64x16xf32, #tpu.memory_space<vmem>>, %arg4: memref<3x128x32xbf16, #tpu.memory_space<vmem>>, %arg5: memref<3x32xf32, #tpu.memory_space<vmem>>, %arg6: memref<3x32x32xf32, #tpu.memory_space<vmem>>, %arg7: memref<3x32xf32, #tpu.memory_space<vmem>>, %arg8: memref<96x32xf32, #tpu.memory_space<vmem>>, %arg9: memref<1x32xf32, #tpu.memory_space<vmem>>, %arg10: memref<1x32xf32, #tpu.memory_space<vmem>>, %arg11: memref<1x32xf32, #tpu.memory_space<vmem>>, %arg12: memref<48x128xf32, #tpu.memory_space<vmem>>, %arg13: memref<1x128xf32, #tpu.memory_space<vmem>>, %arg14: memref<64x128xf32, #tpu.memory_space<vmem>>) attributes {dimension_semantics = [#tpu.dimension_semantics<parallel>], iteration_bounds = array<i64: 2>, scalar_prefetch = 0 : i64, scratch_operands = 0 : i64, tpu.core_type = #tpu.core_type<tc>, window_params = [{transform_indices = @transform_0, window_bounds = array<i64: 5>}, {transform_indices = @transform_1, window_bounds = array<i64: 3, 64, 128>}, {transform_indices = @transform_2, window_bounds = array<i64: 64, 16>}, {pipeline_mode = #tpu.pipeline_mode<synchronous>, transform_indices = @transform_3, window_bounds = array<i64: 3, 128, 32>}, {pipeline_mode = #tpu.pipeline_mode<synchronous>, transform_indices = @transform_4, window_bounds = array<i64: 3, 32>}, {pipeline_mode = #tpu.pipeline_mode<synchronous>, transform_indices = @transform_5, window_bounds = array<i64: 3, 32, 32>}, {pipeline_mode = #tpu.pipeline_mode<synchronous>, transform_indices = @transform_6, window_bounds = array<i64: 3, 32>}, {pipeline_mode = #tpu.pipeline_mode<synchronous>, transform_indices = @transform_7, window_bounds = array<i64: 96, 32>}, {pipeline_mode = #tpu.pipeline_mode<synchronous>, transform_indices = @transform_8, window_bounds = array<i64: 1, 32>}, {pipeline_mode = #tpu.pipeline_mode<synchronous>, transform_indices = @transform_9, window_bounds = array<i64: 1, 32>}, {pipeline_mode = #tpu.pipeline_mode<synchronous>, transform_indices = @transform_10, window_bounds = array<i64: 1, 32>}, {pipeline_mode = #tpu.pipeline_mode<synchronous>, transform_indices = @transform_11, window_bounds = array<i64: 48, 128>}, {pipeline_mode = #tpu.pipeline_mode<synchronous>, transform_indices = @transform_12, window_bounds = array<i64: 1, 128>}, {transform_indices = @transform_13, window_bounds = array<i64: 64, 128>}]} {
    %c0 = arith.constant 0 : index
    %c0_0 = arith.constant 0 : index
    %c0_1 = arith.constant 0 : index
    %0 = vector.load %arg2[%c0, %c0_0, %c0_1] : memref<3x64x128xbf16, #tpu.memory_space<vmem>>, vector<1x64x128xbf16>
    %1 = vector.shape_cast %0 : vector<1x64x128xbf16> to vector<64x128xbf16>
    %c0_2 = arith.constant 0 : index
    %c0_3 = arith.constant 0 : index
    %c0_4 = arith.constant 0 : index
    %2 = vector.load %arg4[%c0_2, %c0_3, %c0_4] : memref<3x128x32xbf16, #tpu.memory_space<vmem>>, vector<1x128x32xbf16>
    %3 = vector.shape_cast %2 : vector<1x128x32xbf16> to vector<128x32xbf16>
    %cst = arith.constant dense<0.000000e+00> : vector<64x32xf32>
    %4 = tpu.matmul %1, %3, %cst {dimension_numbers = #tpu.dot_dimension_numbers<[1], [0], [0], [1], [0, 0, 1, 1], [], []>} : vector<64x128xbf16>, vector<128x32xbf16>, vector<64x32xf32> -> vector<64x32xf32>
    %c0_5 = arith.constant 0 : index
    %c0_6 = arith.constant 0 : index
    %5 = vector.load %arg5[%c0_5, %c0_6] : memref<3x32xf32, #tpu.memory_space<vmem>>, vector<1x32xf32>
    %6 = vector.broadcast %5 : vector<1x32xf32> to vector<64x32xf32>
    %7 = arith.addf %4, %6 : vector<64x32xf32>
    %c0_7 = arith.constant 0 : index
    %8 = memref.load %arg1[%c0_7] : memref<5xf32, #tpu.memory_space<smem>>
    %cst_8 = arith.constant 0.000000e+00 : f32
    %9 = vector.broadcast %cst_8 : f32 to vector<64x32xf32>
    %10 = arith.cmpf oge, %7, %9 : vector<64x32xf32>
    %11 = vector.broadcast %8 : f32 to vector<64x32xf32>
    %12 = arith.mulf %11, %7 : vector<64x32xf32>
    %13 = arith.select %10, %7, %12 : vector<64x32xi1>, vector<64x32xf32>
    %c0_9 = arith.constant 0 : index
    %c0_10 = arith.constant 0 : index
    %c0_11 = arith.constant 0 : index
    %14 = vector.load %arg6[%c0_9, %c0_10, %c0_11] : memref<3x32x32xf32, #tpu.memory_space<vmem>>, vector<1x32x32xf32>
    %15 = vector.shape_cast %14 : vector<1x32x32xf32> to vector<32x32xf32>
    %cst_12 = arith.constant dense<0.000000e+00> : vector<64x32xf32>
    %16 = tpu.matmul %13, %15, %cst_12 {dimension_numbers = #tpu.dot_dimension_numbers<[1], [0], [0], [1], [0, 0, 1, 1], [], []>} : vector<64x32xf32>, vector<32x32xf32>, vector<64x32xf32> -> vector<64x32xf32>
    %c0_13 = arith.constant 0 : index
    %c0_14 = arith.constant 0 : index
    %17 = vector.load %arg7[%c0_13, %c0_14] : memref<3x32xf32, #tpu.memory_space<vmem>>, vector<1x32xf32>
    %18 = vector.broadcast %17 : vector<1x32xf32> to vector<64x32xf32>
    %19 = arith.addf %16, %18 : vector<64x32xf32>
    %c1 = arith.constant 1 : index
    %c0_15 = arith.constant 0 : index
    %c0_16 = arith.constant 0 : index
    %20 = vector.load %arg2[%c1, %c0_15, %c0_16] : memref<3x64x128xbf16, #tpu.memory_space<vmem>>, vector<1x64x128xbf16>
    %21 = vector.shape_cast %20 : vector<1x64x128xbf16> to vector<64x128xbf16>
    %c1_17 = arith.constant 1 : index
    %c0_18 = arith.constant 0 : index
    %c0_19 = arith.constant 0 : index
    %22 = vector.load %arg4[%c1_17, %c0_18, %c0_19] : memref<3x128x32xbf16, #tpu.memory_space<vmem>>, vector<1x128x32xbf16>
    %23 = vector.shape_cast %22 : vector<1x128x32xbf16> to vector<128x32xbf16>
    %cst_20 = arith.constant dense<0.000000e+00> : vector<64x32xf32>
    %24 = tpu.matmul %21, %23, %cst_20 {dimension_numbers = #tpu.dot_dimension_numbers<[1], [0], [0], [1], [0, 0, 1, 1], [], []>} : vector<64x128xbf16>, vector<128x32xbf16>, vector<64x32xf32> -> vector<64x32xf32>
    %c1_21 = arith.constant 1 : index
    %c0_22 = arith.constant 0 : index
    %25 = vector.load %arg5[%c1_21, %c0_22] : memref<3x32xf32, #tpu.memory_space<vmem>>, vector<1x32xf32>
    %26 = vector.broadcast %25 : vector<1x32xf32> to vector<64x32xf32>
    %27 = arith.addf %24, %26 : vector<64x32xf32>
    %c1_23 = arith.constant 1 : index
    %28 = memref.load %arg1[%c1_23] : memref<5xf32, #tpu.memory_space<smem>>
    %cst_24 = arith.constant 0.000000e+00 : f32
    %29 = vector.broadcast %cst_24 : f32 to vector<64x32xf32>
    %30 = arith.cmpf oge, %27, %29 : vector<64x32xf32>
    %31 = vector.broadcast %28 : f32 to vector<64x32xf32>
    %32 = arith.mulf %31, %27 : vector<64x32xf32>
    %33 = arith.select %30, %27, %32 : vector<64x32xi1>, vector<64x32xf32>
    %c1_25 = arith.constant 1 : index
    %c0_26 = arith.constant 0 : index
    %c0_27 = arith.constant 0 : index
    %34 = vector.load %arg6[%c1_25, %c0_26, %c0_27] : memref<3x32x32xf32, #tpu.memory_space<vmem>>, vector<1x32x32xf32>
    %35 = vector.shape_cast %34 : vector<1x32x32xf32> to vector<32x32xf32>
    %cst_28 = arith.constant dense<0.000000e+00> : vector<64x32xf32>
    %36 = tpu.matmul %33, %35, %cst_28 {dimension_numbers = #tpu.dot_dimension_numbers<[1], [0], [0], [1], [0, 0, 1, 1], [], []>} : vector<64x32xf32>, vector<32x32xf32>, vector<64x32xf32> -> vector<64x32xf32>
    %c1_29 = arith.constant 1 : index
    %c0_30 = arith.constant 0 : index
    %37 = vector.load %arg7[%c1_29, %c0_30] : memref<3x32xf32, #tpu.memory_space<vmem>>, vector<1x32xf32>
    %38 = vector.broadcast %37 : vector<1x32xf32> to vector<64x32xf32>
    %39 = arith.addf %36, %38 : vector<64x32xf32>
    %c2 = arith.constant 2 : index
    %c0_31 = arith.constant 0 : index
    %c0_32 = arith.constant 0 : index
    %40 = vector.load %arg2[%c2, %c0_31, %c0_32] : memref<3x64x128xbf16, #tpu.memory_space<vmem>>, vector<1x64x128xbf16>
    %41 = vector.shape_cast %40 : vector<1x64x128xbf16> to vector<64x128xbf16>
    %c2_33 = arith.constant 2 : index
    %c0_34 = arith.constant 0 : index
    %c0_35 = arith.constant 0 : index
    %42 = vector.load %arg4[%c2_33, %c0_34, %c0_35] : memref<3x128x32xbf16, #tpu.memory_space<vmem>>, vector<1x128x32xbf16>
    %43 = vector.shape_cast %42 : vector<1x128x32xbf16> to vector<128x32xbf16>
    %cst_36 = arith.constant dense<0.000000e+00> : vector<64x32xf32>
    %44 = tpu.matmul %41, %43, %cst_36 {dimension_numbers = #tpu.dot_dimension_numbers<[1], [0], [0], [1], [0, 0, 1, 1], [], []>} : vector<64x128xbf16>, vector<128x32xbf16>, vector<64x32xf32> -> vector<64x32xf32>
    %c2_37 = arith.constant 2 : index
    %c0_38 = arith.constant 0 : index
    %45 = vector.load %arg5[%c2_37, %c0_38] : memref<3x32xf32, #tpu.memory_space<vmem>>, vector<1x32xf32>
    %46 = vector.broadcast %45 : vector<1x32xf32> to vector<64x32xf32>
    %47 = arith.addf %44, %46 : vector<64x32xf32>
    %c2_39 = arith.constant 2 : index
    %48 = memref.load %arg1[%c2_39] : memref<5xf32, #tpu.memory_space<smem>>
    %cst_40 = arith.constant 0.000000e+00 : f32
    %49 = vector.broadcast %cst_40 : f32 to vector<64x32xf32>
    %50 = arith.cmpf oge, %47, %49 : vector<64x32xf32>
    %51 = vector.broadcast %48 : f32 to vector<64x32xf32>
    %52 = arith.mulf %51, %47 : vector<64x32xf32>
    %53 = arith.select %50, %47, %52 : vector<64x32xi1>, vector<64x32xf32>
    %c2_41 = arith.constant 2 : index
    %c0_42 = arith.constant 0 : index
    %c0_43 = arith.constant 0 : index
    %54 = vector.load %arg6[%c2_41, %c0_42, %c0_43] : memref<3x32x32xf32, #tpu.memory_space<vmem>>, vector<1x32x32xf32>
    %55 = vector.shape_cast %54 : vector<1x32x32xf32> to vector<32x32xf32>
    %cst_44 = arith.constant dense<0.000000e+00> : vector<64x32xf32>
    %56 = tpu.matmul %53, %55, %cst_44 {dimension_numbers = #tpu.dot_dimension_numbers<[1], [0], [0], [1], [0, 0, 1, 1], [], []>} : vector<64x32xf32>, vector<32x32xf32>, vector<64x32xf32> -> vector<64x32xf32>
    %c2_45 = arith.constant 2 : index
    %c0_46 = arith.constant 0 : index
    %57 = vector.load %arg7[%c2_45, %c0_46] : memref<3x32xf32, #tpu.memory_space<vmem>>, vector<1x32xf32>
    %58 = vector.broadcast %57 : vector<1x32xf32> to vector<64x32xf32>
    %59 = arith.addf %56, %58 : vector<64x32xf32>
    %60 = tpu.concatenate %19, %39, %59 in 1 : vector<64x32xf32>, vector<64x32xf32>, vector<64x32xf32> -> vector<64x96xf32>
    %c0_47 = arith.constant 0 : index
    %c0_48 = arith.constant 0 : index
    %61 = vector.load %arg8[%c0_47, %c0_48] : memref<96x32xf32, #tpu.memory_space<vmem>>, vector<96x32xf32>
    %cst_49 = arith.constant dense<0.000000e+00> : vector<64x32xf32>
    %62 = tpu.matmul %60, %61, %cst_49 {dimension_numbers = #tpu.dot_dimension_numbers<[1], [0], [0], [1], [0, 0, 1, 1], [], []>} : vector<64x96xf32>, vector<96x32xf32>, vector<64x32xf32> -> vector<64x32xf32>
    %c0_50 = arith.constant 0 : index
    %c0_51 = arith.constant 0 : index
    %63 = vector.load %arg9[%c0_50, %c0_51] : memref<1x32xf32, #tpu.memory_space<vmem>>, vector<1x32xf32>
    %64 = vector.broadcast %63 : vector<1x32xf32> to vector<64x32xf32>
    %65 = arith.addf %62, %64 : vector<64x32xf32>
    %c3 = arith.constant 3 : index
    %66 = memref.load %arg1[%c3] : memref<5xf32, #tpu.memory_space<smem>>
    %cst_52 = arith.constant 0.000000e+00 : f32
    %67 = vector.broadcast %cst_52 : f32 to vector<64x32xf32>
    %68 = arith.cmpf oge, %65, %67 : vector<64x32xf32>
    %69 = vector.broadcast %66 : f32 to vector<64x32xf32>
    %70 = arith.mulf %69, %65 : vector<64x32xf32>
    %71 = arith.select %68, %65, %70 : vector<64x32xi1>, vector<64x32xf32>
    %c4 = arith.constant 4 : index
    %72 = memref.load %arg1[%c4] : memref<5xf32, #tpu.memory_space<smem>>
    %c0_53 = arith.constant 0 : index
    %c0_54 = arith.constant 0 : index
    %73 = vector.load %arg10[%c0_53, %c0_54] : memref<1x32xf32, #tpu.memory_space<vmem>>, vector<1x32xf32>
    %c0_55 = arith.constant 0 : index
    %c0_56 = arith.constant 0 : index
    %74 = vector.load %arg11[%c0_55, %c0_56] : memref<1x32xf32, #tpu.memory_space<vmem>>, vector<1x32xf32>
    %75 = vector.broadcast %73 : vector<1x32xf32> to vector<64x32xf32>
    %76 = arith.mulf %71, %75 : vector<64x32xf32>
    %cst_57 = arith.constant dense<0.000000e+00> : vector<64xf32>
    %77 = vector.multi_reduction <add>, %76, %cst_57 [1] : vector<64x32xf32> to vector<64xf32>
    %78 = vector.shape_cast %77 : vector<64xf32> to vector<64x1xf32>
    %79 = vector.broadcast %74 : vector<1x32xf32> to vector<64x32xf32>
    %80 = arith.mulf %19, %79 : vector<64x32xf32>
    %cst_58 = arith.constant dense<0.000000e+00> : vector<64xf32>
    %81 = vector.multi_reduction <add>, %80, %cst_58 [1] : vector<64x32xf32> to vector<64xf32>
    %82 = vector.shape_cast %81 : vector<64xf32> to vector<64x1xf32>
    %83 = arith.addf %78, %82 : vector<64x1xf32>
    %84 = vector.broadcast %72 : f32 to vector<64x1xf32>
    %85 = arith.addf %83, %84 : vector<64x1xf32>
    %cst_59 = arith.constant 0.000000e+00 : f32
    %86 = vector.broadcast %cst_59 : f32 to vector<64x1xf32>
    %87 = arith.maximumf %85, %86 : vector<64x1xf32>
    %88 = vector.broadcast %74 : vector<1x32xf32> to vector<64x32xf32>
    %89 = arith.mulf %39, %88 : vector<64x32xf32>
    %cst_60 = arith.constant dense<0.000000e+00> : vector<64xf32>
    %90 = vector.multi_reduction <add>, %89, %cst_60 [1] : vector<64x32xf32> to vector<64xf32>
    %91 = vector.shape_cast %90 : vector<64xf32> to vector<64x1xf32>
    %92 = arith.addf %78, %91 : vector<64x1xf32>
    %93 = vector.broadcast %72 : f32 to vector<64x1xf32>
    %94 = arith.addf %92, %93 : vector<64x1xf32>
    %cst_61 = arith.constant 0.000000e+00 : f32
    %95 = vector.broadcast %cst_61 : f32 to vector<64x1xf32>
    %96 = arith.maximumf %94, %95 : vector<64x1xf32>
    %97 = vector.broadcast %74 : vector<1x32xf32> to vector<64x32xf32>
    %98 = arith.mulf %59, %97 : vector<64x32xf32>
    %cst_62 = arith.constant dense<0.000000e+00> : vector<64xf32>
    %99 = vector.multi_reduction <add>, %98, %cst_62 [1] : vector<64x32xf32> to vector<64xf32>
    %100 = vector.shape_cast %99 : vector<64xf32> to vector<64x1xf32>
    %101 = arith.addf %78, %100 : vector<64x1xf32>
    %102 = vector.broadcast %72 : f32 to vector<64x1xf32>
    %103 = arith.addf %101, %102 : vector<64x1xf32>
    %cst_63 = arith.constant 0.000000e+00 : f32
    %104 = vector.broadcast %cst_63 : f32 to vector<64x1xf32>
    %105 = arith.maximumf %103, %104 : vector<64x1xf32>
    %106 = arith.maximumf %87, %96 : vector<64x1xf32>
    %107 = arith.maximumf %106, %105 : vector<64x1xf32>
    %108 = arith.subf %87, %107 : vector<64x1xf32>
    %109 = math.exp %108 : vector<64x1xf32>
    %110 = arith.subf %96, %107 : vector<64x1xf32>
    %111 = math.exp %110 : vector<64x1xf32>
    %112 = arith.subf %105, %107 : vector<64x1xf32>
    %113 = math.exp %112 : vector<64x1xf32>
    %114 = arith.addf %109, %111 : vector<64x1xf32>
    %115 = arith.addf %114, %113 : vector<64x1xf32>
    %116 = tpu.reciprocal %115 {approx = true} : vector<64x1xf32> -> vector<64x1xf32>
    %117 = arith.mulf %109, %116 : vector<64x1xf32>
    %118 = vector.broadcast %117 : vector<64x1xf32> to vector<64x32xf32>
    %119 = arith.mulf %19, %118 : vector<64x32xf32>
    %120 = arith.mulf %111, %116 : vector<64x1xf32>
    %121 = vector.broadcast %120 : vector<64x1xf32> to vector<64x32xf32>
    %122 = arith.mulf %39, %121 : vector<64x32xf32>
    %123 = arith.addf %119, %122 : vector<64x32xf32>
    %124 = arith.mulf %113, %116 : vector<64x1xf32>
    %125 = vector.broadcast %124 : vector<64x1xf32> to vector<64x32xf32>
    %126 = arith.mulf %59, %125 : vector<64x32xf32>
    %127 = arith.addf %123, %126 : vector<64x32xf32>
    %c0_64 = arith.constant 0 : index
    %c0_65 = arith.constant 0 : index
    %128 = vector.load %arg3[%c0_64, %c0_65] : memref<64x16xf32, #tpu.memory_space<vmem>>, vector<64x16xf32>
    %129 = tpu.concatenate %127, %128 in 1 : vector<64x32xf32>, vector<64x16xf32> -> vector<64x48xf32>
    %c0_66 = arith.constant 0 : index
    %c0_67 = arith.constant 0 : index
    %130 = vector.load %arg12[%c0_66, %c0_67] : memref<48x128xf32, #tpu.memory_space<vmem>>, vector<48x128xf32>
    %cst_68 = arith.constant dense<0.000000e+00> : vector<64x128xf32>
    %131 = tpu.matmul %129, %130, %cst_68 {dimension_numbers = #tpu.dot_dimension_numbers<[1], [0], [0], [1], [0, 0, 1, 1], [], []>} : vector<64x48xf32>, vector<48x128xf32>, vector<64x128xf32> -> vector<64x128xf32>
    %c0_69 = arith.constant 0 : index
    %c0_70 = arith.constant 0 : index
    %132 = vector.load %arg13[%c0_69, %c0_70] : memref<1x128xf32, #tpu.memory_space<vmem>>, vector<1x128xf32>
    %133 = vector.broadcast %132 : vector<1x128xf32> to vector<64x128xf32>
    %134 = arith.addf %131, %133 : vector<64x128xf32>
    %c0_71 = arith.constant 0 : index
    %c0_72 = arith.constant 0 : index
    %135 = vector.load %arg14[%c0_71, %c0_72] : memref<64x128xf32, #tpu.memory_space<vmem>>, vector<64x128xf32>
    tpu.vector_store %arg14[%c0_71, %c0_72], %134 {strides = array<i32>} : memref<64x128xf32, #tpu.memory_space<vmem>>, vector<64x128xf32>,
    return
  }
  func.func @transform_0(%arg0: i32) -> i32 {
    %c0_i32 = arith.constant 0 : i32
    %c0_i32_0 = arith.constant 0 : i32
    return %c0_i32 : i32
  }
  func.func @transform_1(%arg0: i32) -> (i32, i32, i32) {
    %c0_i32 = arith.constant 0 : i32
    %c0_i32_0 = arith.constant 0 : i32
    %c0_i32_1 = arith.constant 0 : i32
    return %c0_i32, %arg0, %c0_i32_0 : i32, i32, i32
  }
  func.func @transform_2(%arg0: i32) -> (i32, i32) {
    %c0_i32 = arith.constant 0 : i32
    %c0_i32_0 = arith.constant 0 : i32
    return %arg0, %c0_i32 : i32, i32
  }
  func.func @transform_3(%arg0: i32) -> (i32, i32, i32) {
    %c0_i32 = arith.constant 0 : i32
    %c0_i32_0 = arith.constant 0 : i32
    %c0_i32_1 = arith.constant 0 : i32
    %c0_i32_2 = arith.constant 0 : i32
    return %c0_i32, %c0_i32_0, %c0_i32_1 : i32, i32, i32
  }
  func.func @transform_4(%arg0: i32) -> (i32, i32) {
    %c0_i32 = arith.constant 0 : i32
    %c0_i32_0 = arith.constant 0 : i32
    %c0_i32_1 = arith.constant 0 : i32
    return %c0_i32, %c0_i32_0 : i32, i32
  }
  func.func @transform_5(%arg0: i32) -> (i32, i32, i32) {
    %c0_i32 = arith.constant 0 : i32
    %c0_i32_0 = arith.constant 0 : i32
    %c0_i32_1 = arith.constant 0 : i32
    %c0_i32_2 = arith.constant 0 : i32
    return %c0_i32, %c0_i32_0, %c0_i32_1 : i32, i32, i32
  }
  func.func @transform_6(%arg0: i32) -> (i32, i32) {
    %c0_i32 = arith.constant 0 : i32
    %c0_i32_0 = arith.constant 0 : i32
    %c0_i32_1 = arith.constant 0 : i32
    return %c0_i32, %c0_i32_0 : i32, i32
  }
  func.func @transform_7(%arg0: i32) -> (i32, i32) {
    %c0_i32 = arith.constant 0 : i32
    %c0_i32_0 = arith.constant 0 : i32
    %c0_i32_1 = arith.constant 0 : i32
    return %c0_i32, %c0_i32_0 : i32, i32
  }
  func.func @transform_8(%arg0: i32) -> (i32, i32) {
    %c0_i32 = arith.constant 0 : i32
    %c0_i32_0 = arith.constant 0 : i32
    %c0_i32_1 = arith.constant 0 : i32
    return %c0_i32, %c0_i32_0 : i32, i32
  }
  func.func @transform_9(%arg0: i32) -> (i32, i32) {
    %c0_i32 = arith.constant 0 : i32
    %c0_i32_0 = arith.constant 0 : i32
    %c0_i32_1 = arith.constant 0 : i32
    return %c0_i32, %c0_i32_0 : i32, i32
  }
  func.func @transform_10(%arg0: i32) -> (i32, i32) {
    %c0_i32 = arith.constant 0 : i32
    %c0_i32_0 = arith.constant 0 : i32
    %c0_i32_1 = arith.constant 0 : i32
    return %c0_i32, %c0_i32_0 : i32, i32
  }
  func.func @transform_11(%arg0: i32) -> (i32, i32) {
    %c0_i32 = arith.constant 0 : i32
    %c0_i32_0 = arith.constant 0 : i32
    %c0_i32_1 = arith.constant 0 : i32
    return %c0_i32, %c0_i32_0 : i32, i32
  }
  func.func @transform_12(%arg0: i32) -> (i32, i32) {
    %c0_i32 = arith.constant 0 : i32
    %c0_i32_0 = arith.constant 0 : i32
    %c0_i32_1 = arith.constant 0 : i32
    return %c0_i32, %c0_i32_0 : i32, i32
  }
  func.func @transform_13(%arg0: i32) -> (i32, i32) {
    %c0_i32 = arith.constant 0 : i32
    %c0_i32_0 = arith.constant 0 : i32
    return %arg0, %c0_i32 : i32, i32
  }
}

</mosaic_0001>

<bundles_post_ra>
// kernel: nars_jk_gamlp_forward.1
= control target key start
LH: loop header
LB: loop body
LE: loop exit
PB: predicated region body
PF: predicated region fallthrough
CT: control target
= control target key end

     0   :  { %18 = vsyncpa [#allocation3], 0  ;;  %s3319_s25 = smov 0   ;;  %s3321_s26 = smov 0   ;;  %s4045_s0 = inlined_call_operand.vmem [shape: f32[5], index: 0, kind: input, shape index: {}]   ;;  %s4046_s1 = inlined_call_operand.vmem [shape: bf16[3,128,128], index: 1, kind: input, shape index: {}]   ;;  %s4047_s2 = inlined_call_operand.vmem [shape: f32[128,16], index: 2, kind: input, shape index: {}]   ;;  %s4048_s3 = inlined_call_operand.vmem [shape: bf16[3,128,32], index: 3, kind: input, shape index: {}]   ;;  %s4049_s4 = inlined_call_operand.vmem [shape: f32[3,32], index: 4, kind: input, shape index: {}]   ;;  %s4050_s5 = inlined_call_operand.vmem [shape: f32[3,32,32], index: 5, kind: input, shape index: {}]   ;;  %s4051_s6 = inlined_call_operand.vmem [shape: f32[3,32], index: 6, kind: input, shape index: {}]   ;;  %s4052_s7 = inlined_call_operand.vmem [shape: f32[96,32], index: 7, kind: input, shape index: {}]   ;;  %s4053_s8 = inlined_call_operand.vmem [shape: f32[1,32], index: 8, kind: input, shape index: {}]   ;;  %s4054_s9 = inlined_call_operand.vmem [shape: f32[1,32], index: 9, kind: input, shape index: {}]   ;;  %s4055_s10 = inlined_call_operand.vmem [shape: f32[1,32], index: 10, kind: input, shape index: {}]   ;;  %s4056_s11 = inlined_call_operand.vmem [shape: f32[48,128], index: 11, kind: input, shape index: {}]   ;;  %s4057_s12 = inlined_call_operand.vmem [shape: f32[1,128], index: 12, kind: input, shape index: {}]   ;;  %s4058_s13 = inlined_call_operand.vmem [shape: f32[128,128], index: 13, kind: output, shape index: {}]  }
   0x1   :  { %s3323_s27 = smov 0  }
   0x2 LB: > { %s2544_s28 = sadd.s32 4294967295, %s3244_s27   ;;  %s3336_s29 = sadd.s32 1, %s3244_s27   ;;  %s3244_s27 = sphi %s3323_s27, %s4070_s27   ;;  %s3240_s26 = sphi %s3321_s26, %s4069_s26   ;;  %s3236_s25 = sphi %s3319_s25, %s4068_s25  }
   0x3   : > { %s49_s30 = ssub.s32 %s3244_s27, %s3336_s29  ;;  %s52_s14 = sadd.s32 1, %s3240_s26 }
   0x4   : > { %p50_p0 = scmp.eq.s32.totalorder %s49_s30, 0  ;;  %p59_p1 = scmp.ne.s32.totalorder %s3240_s26, %s3236_s25 }
   0x5   : > { %p60_p2 = scmp.eq.s32.totalorder %s3244_s27, 0  ;;  %p2546_p3 = scmp.ge.s32.totalorder %s3244_s27, 1 }
   0x6   : > { %s3346_s15 = scalar_select %p50_p0, %s3240_s26, %s52_s14  }
   0x7   : > { %p3348_p4 = por %p60_p2, %p59_p1  ;;  %p338_p5 = scmp.lt.s32.totalorder %s3244_s27, 3 }
   0x8   : > { %p3355_p6 = scmp.eq.s32.totalorder %s2544_s28, 0  ;;  %s351_s21 = sshll.u32 %s4045_s0, 4  ;;  %s352_s21 = int_to_ptr.vmem [resolvable:$true] %s351_s21 }
   0x9   : > { %p3359_p7 = pnand %p2546_p3, %p338_p5  ;;  %s3203_s22 = scalar_lea.vmem %s352_s21, 16 }
   0xa   : > { %p3204_p10 = scmp.ne.s32.totalorder %s352_s21, %s3203_s22  ;;  %p3211_p0 = scmp.lt.s32.totalorder %s352_s21, %s352_s21 }
   0xb   : > { %p3070_p8 = pneg %p3359_p7  ;;  %p3212_p1 = scmp.lt.s32.totalorder %s3203_s22, %s3203_s22 }
   0xd   : > { %p3071_p9 = pnand %p3355_p6, %p3070_p8  ;;  %p3213_p2 = por %p3212_p1, %p3211_p0 }
   0xf   : > { %p3205_p11 = pneg %p3071_p9 }
  0x11   : > { %p3206_p12 = pnand %p3205_p11, %p3204_p10 }
  0x13   : > { %p3207_p13 = pneg %p3206_p12 }
  0x15   : > { %p3214_p3 = pnand %p3213_p2, %p3207_p13 }
  0x17   : > { %3217 = shalt.err (!%p3214_p3)
}
  0x18   : > { %s3246_s23 = smov [#allocation2]   ;;  %p2548_p5 = scmp.ge.s32.totalorder %s3244_s27, 2 }
  0x19   : > { %3073 = dma.vmem_to_smem (!%p3071_p9), %s352_s21, 16, %s3246_s23, [#allocation3]  }
  0x1a   : > { %388 = sbr.rel (%p2548_p5) target bundleno = 44 (0x2c), region = 60 }
  0x21   : > { %391 = sbr.rel (!%p3348_p4) target bundleno = 44 (0x2c), region = 64  ;;  %s393_s24 = sand.u32 (%p3348_p4), 1, %s3240_s26  }
  0x22   : > { %s2705_s30 = sshll.u32 (%p3348_p4), %s3244_s27, 5  ;;  %s3064_s14 = smul.u32 (%p3348_p4), 96, %s393_s24 }
  0x23   : > { %s398_s22 = scalar_lea.vmem (%p3348_p4), %s4046_s1, %s2705_s30 }
  0x24   : > { %v414_v0 = vld [vmem:[%s398_s22] sm:$0xff] (%p3348_p4)   ;;  %v418_v1 = vld [vmem:[%s398_s22 + $0x8] sm:$0xff] (%p3348_p4)   ;;  %v422_v2 = vld [vmem:[%s398_s22 + $0x10] sm:$0xff] (%p3348_p4)   ;;  %s395_s21 = scalar_lea.vmem (%p3348_p4), [#allocation4], %s3064_s14 }
  0x25   : > { %v426_v3 = vld [vmem:[%s398_s22 + $0x18] sm:$0xff] (%p3348_p4)   ;;  %v430_v4 = vld [vmem:[%s398_s22 + $0x40] sm:$0xff] (%p3348_p4)   ;;  %v434_v5 = vld [vmem:[%s398_s22 + $0x48] sm:$0xff] (%p3348_p4)   ;;  %415 = vst [vmem:[%s395_s21] sm:$0xff] (%p3348_p4), %v414_v0  }
  0x26   : > { %419 = vst [vmem:[%s395_s21 + $0x8] sm:$0xff] (%p3348_p4), %v418_v1   ;;  %423 = vst [vmem:[%s395_s21 + $0x10] sm:$0xff] (%p3348_p4), %v422_v2   ;;  %v438_v6 = vld [vmem:[%s398_s22 + $0x50] sm:$0xff] (%p3348_p4)   ;;  %v442_v7 = vld [vmem:[%s398_s22 + $0x58] sm:$0xff] (%p3348_p4)  }
  0x27   : > { %427 = vst [vmem:[%s395_s21 + $0x18] sm:$0xff] (%p3348_p4), %v426_v3   ;;  %431 = vst [vmem:[%s395_s21 + $0x20] sm:$0xff] (%p3348_p4), %v430_v4   ;;  %v446_v8 = vld [vmem:[%s398_s22 + $0x80] sm:$0xff] (%p3348_p4)   ;;  %v450_v9 = vld [vmem:[%s398_s22 + $0x88] sm:$0xff] (%p3348_p4)  }
  0x28   : > { %435 = vst [vmem:[%s395_s21 + $0x28] sm:$0xff] %v434_v5   ;;  %439 = vst [vmem:[%s395_s21 + $0x30] sm:$0xff] %v438_v6   ;;  %v454_v10 = vld [vmem:[%s398_s22 + $0x90] sm:$0xff]   ;;  %v458_v11 = vld [vmem:[%s398_s22 + $0x98] sm:$0xff]  }
  0x29   : > { %443 = vst [vmem:[%s395_s21 + $0x38] sm:$0xff] %v442_v7   ;;  %447 = vst [vmem:[%s395_s21 + $0x40] sm:$0xff] %v446_v8  }
  0x2a   : > { %451 = vst [vmem:[%s395_s21 + $0x48] sm:$0xff] %v450_v9   ;;  %455 = vst [vmem:[%s395_s21 + $0x50] sm:$0xff] %v454_v10  }
  0x2b   : > { %459 = vst [vmem:[%s395_s21 + $0x58] sm:$0xff] %v458_v11  }
  0x2c PF: > { %544 = sbr.rel (%p3359_p7) target bundleno = 1596 (0x63c), region = 109 }
  0x33   : > { %3231 = dma.done.wait (%p3355_p6), [#allocation3], 16  }
  0x34   : > { %3233 = vsyncadd (%p3355_p6), [#allocation3], 4294967280  ;;  %s551_s16 = sand.u32 1, %s3236_s25  }
  0x35   : > { %s3065_s23 = smul.u32 96, %s551_s16 }
  0x37   : > { %s3385_s24 = scalar_lea.vmem [#allocation4], %s3065_s23 }
  0x38   : > { %557 = sfence }
  0x39   : > { %v3103_v12 = vld [vmem:[%s4048_s3] sm:$0xff]   ;;  %v3104_v13 = vld [vmem:[%s4048_s3 + $0x8] sm:$0xff]   ;;  %v3105_v14 = vld [vmem:[%s4048_s3 + $0x10] sm:$0xff]   ;;  %s780_s17 = sld [smem:[#allocation2]]  ;;  %vm815_vm1 = vcmask 261120   ;;  %s2667_s30 = sld [smem:[#allocation2 + $0x2]] }
  0x3a   : > { %2812 = vmatprep.subr.bf16.mxu0 %v3103_v12  ;;  %v3106_v15 = vld [vmem:[%s4048_s3 + $0x18] sm:$0xff]   ;;  %v3111_v16 = vld [vmem:[%s3385_s24] sm:$0xff]   ;;  %v3108_v18 = vld [vmem:[%s4048_s3 + $0x28] sm:$0xff]   ;;  %s3247_s21 = smov 32   ;;  %s3248_s16 = smov 64  }
  0x3b   : > { %2813 = vmatpush3.bf16.msra.mxu0 %v3103_v12  ;;  %2828 = vmatprep.mubr.bf16.mxu0 %v3111_v16  ;;  %v3107_v17 = vld [vmem:[%s4048_s3 + $0x20] sm:$0xff]   ;;  %v3109_v19 = vld [vmem:[%s4048_s3 + $0x30] sm:$0xff]   ;;  %v3110_v20 = vld [vmem:[%s4048_s3 + $0x38] sm:$0xff]   ;;  %s2690_s19 = sld [smem:[#allocation2 + $0x3]]  ;;  %s2553_s22 = sshll.u32 %s2544_s28, 3 }
  0x3c   : > { %2814 = vmatprep.subr.bf16.mxu0 %v3104_v13  ;;  %v3112_v21 = vld [vmem:[%s3385_s24 + $0x8] sm:$0xff]   ;;  %v3113_v22 = vld [vmem:[%s3385_s24 + $0x10] sm:$0xff]   ;;  %v3114_v23 = vld [vmem:[%s3385_s24 + $0x18] sm:$0xff]   ;;  %p602_p4 = scmp.lt.s32.totalorder %s2553_s22, 15  ;;  %s2691_s27 = sld [smem:[#allocation2 + $0x4]] }
  0x3d   : > { %v806_v24 = vld [vmem:[%s4050_s5] sm:$0xff]  ;;  %v807_v25 = vld [vmem:[%s4050_s5 + $0x8] sm:$0xff]  ;;  %v808_v27 = vld [vmem:[%s4050_s5 + $0x10] sm:$0xff] }
  0x3e   : > { %v3004_v26 = vpack.c.bf16 %v807_v25, %v806_v24  ;;  %v809_v28 = vld [vmem:[%s4050_s5 + $0x18] sm:$0xff]  ;;  %v3115_v30 = vld [vmem:[%s4048_s3 + $0x40] sm:$0xff]   ;;  %v3116_v46 = vld [vmem:[%s4048_s3 + $0x48] sm:$0xff]   ;;  %s4072_s22 = smov (!%p602_p4, %s2553_s22), 15 }
  0x3f   : > { %2815 = vmatpush3.bf16.msra.mxu0 %v3104_v13  ;;  %v3008_v29 = vpack.c.bf16 %v809_v28, %v808_v27  ;;  %v2557_v31 = vld [vmem:[%s4049_s4] ss:$0 sm:$0xff]  ;;  %v789_v34 = vstv %s780_s17  ;;  %v3117_v57 = vld [vmem:[%s4048_s3 + $0x50] sm:$0xff]   ;;  %v3118_v0 = vld [vmem:[%s4048_s3 + $0x58] sm:$0xff]   ;;  %s2616_s17 = sld [smem:[#allocation2 + $0x1]] }
  0x40   : > { %2816 = vmatprep.subr.bf16.mxu0 %v3105_v14  ;;  %3005 = vmatprep.subr.bf16.mxu1 %v3004_v26  ;;  %v3123_v4 = vld [vmem:[%s3385_s24 + $0x20] sm:$0xff]   ;;  %v3120_v6 = vld [vmem:[%s4048_s3 + $0x68] sm:$0xff]   ;;  %v3121_v7 = vld [vmem:[%s4048_s3 + $0x70] sm:$0xff]  }
  0x41   : > { %3007 = vmatpush3.bf16.msra.mxu1 %v3004_v26  ;;  %v3119_v5 = vld [vmem:[%s4048_s3 + $0x60] sm:$0xff]   ;;  %v3122_v8 = vld [vmem:[%s4048_s3 + $0x78] sm:$0xff]   ;;  %v3124_v10 = vld [vmem:[%s3385_s24 + $0x28] sm:$0xff]  }
  0x42   : > { %3009 = vmatprep.subr.bf16.mxu1 %v3008_v29  ;;  %v3125_v9 = vld [vmem:[%s4048_s3 + $0x80] sm:$0xff]   ;;  %v3127_v11 = vld [vmem:[%s3385_s24 + $0x30] sm:$0xff]   ;;  %v3126_v12 = vld [vmem:[%s4048_s3 + $0x88] sm:$0xff]  }
  0x43   : > { %2817 = vmatpush3.bf16.msra.mxu0 %v3105_v14  ;;  %v3129_v13 = vld [vmem:[%s4048_s3 + $0x90] sm:$0xff]   ;;  %v3128_v14 = vld [vmem:[%s3385_s24 + $0x38] sm:$0xff]   ;;  %v2617_v24 = vld [vmem:[%s4050_s5 + $0x20] sm:$0xff] }
  0x44   : > { %2818 = vmatprep.subr.bf16.mxu0 %v3106_v15  ;;  %v3130_v16 = vld [vmem:[%s4048_s3 + $0x98] sm:$0xff]   ;;  %v2618_v25 = vld [vmem:[%s4050_s5 + $0x28] sm:$0xff]  ;;  %v2619_v27 = vld [vmem:[%s4050_s5 + $0x30] sm:$0xff] }
  0x45   : > { %3011 = vmatpush3.bf16.msra.mxu1 %v3008_v29  ;;  %v3012_v26 = vpack.c.bf16 %v2618_v25, %v2617_v24  ;;  %v2620_v28 = vld [vmem:[%s4050_s5 + $0x38] sm:$0xff] }
  0x46   : > { %2856 = vmatprep.subr.bf16.mxu1 %v3115_v30  ;;  %v3016_v29 = vpack.c.bf16 %v2620_v28, %v2619_v27 }
  0x47   : > { %2819 = vmatpush3.bf16.msra.mxu0 %v3106_v15  ;;  %v3135_v15 = vld [vmem:[%s3385_s24 + $0x40] sm:$0xff]  }
  0x48   : > { %2820 = vmatprep.subr.bf16.mxu0 %v3107_v17 }
  0x4b   : > { %2821 = vmatpush3.bf16.msra.mxu0 %v3107_v17  ;;  %v3131_v17 = vld [vmem:[%s4048_s3 + $0xa0] sm:$0xff]  }
  0x4c   : > { %2822 = vmatprep.subr.bf16.mxu0 %v3108_v18 }
  0x4f   : > { %2823 = vmatpush3.bf16.msra.mxu0 %v3108_v18  ;;  %v3132_v18 = vld [vmem:[%s4048_s3 + $0xa8] sm:$0xff]  }
  0x50   : > { %2824 = vmatprep.subr.bf16.mxu0 %v3109_v19 }
  0x53   : > { %2825 = vmatpush3.bf16.msra.mxu0 %v3109_v19  ;;  %v3133_v19 = vld [vmem:[%s4048_s3 + $0xb0] sm:$0xff]  }
  0x54   : > { %2826 = vmatprep.subr.bf16.mxu0 %v3110_v20 }
  0x57   : > { %2827 = vmatpush3.bf16.msra.mxu0 %v3110_v20  ;;  %v3134_v20 = vld [vmem:[%s4048_s3 + $0xb8] sm:$0xff]  }
  0x58   : > { %3013 = vmatprep.subr.bf16.mxu0 %v3012_v26 }
  0x5a   : > { %2829 = vmatmul.mubr.bf16.vlgmr.msra.gmra.mrb[0].mxu0 %v3112_v21  ;;  %v3136_v21 = vld [vmem:[%s3385_s24 + $0x48] sm:$0xff]  }
  0x5b   : > { %2832 = vmatprep.mubr.bf16.mxu0 %v3113_v22  ;;  %v3137_v22 = vld [vmem:[%s3385_s24 + $0x50] sm:$0xff]   ;;  %3015 = vmatpush3.bf16.msra.mxu0 %v3012_v26 }
  0x5c   : > { %3017 = vmatprep.subr.bf16.mxu0 %v3016_v29 }
  0x5f   : > { %3019 = vmatpush3.bf16.msra.mxu0 %v3016_v29 }
  0x62   : > { %2833 = vmatmul.mubr.bf16.gmra.mrb[4].mxu0 %v3114_v23  ;;  %v3138_v23 = vld [vmem:[%s3385_s24 + $0x58] sm:$0xff]  }
 0x12d   : > { %v2830_v32 = vpop.f32.mrb[0].mxu0 }
 0x12e   : > { %v758_v33 = vadd.f32 %v2830_v32, %v2557_v31  ;;  %v749_v35 = vpop.f32.mrb[1].mxu0 }
 0x12f   : > { %v750_v36 = vadd.f32 %v2557_v31, %v749_v35  ;;  %v2831_v37 = vpop.f32.mrb[2].mxu0 }
 0x130   : > { %v761_v38 = vadd.f32 %v2831_v37, %v2557_v31  ;;  %v752_v39 = vpop.f32.mrb[3].mxu0  ;;  %v792_v42 = vmul.f32 %v789_v34, %v758_v33  ;;  %vm783_vm2 = vcmp.ge.f32.partialorder %v758_v33, 0.0 }
 0x131   : > { %v753_v40 = vadd.f32 %v2557_v31, %v752_v39  ;;  %vm781_vm0 = vcmp.ge.f32.partialorder %v750_v36, 0.0  ;;  %v790_v41 = vmul.f32 %v789_v34, %v750_v36 }
 0x132   : > { %v793_v45 = vmul.f32 %v789_v34, %v761_v38  ;;  %vm784_vm4 = vcmp.ge.f32.partialorder %v761_v38, 0.0  ;;  %v800_v49 = vsel %vm783_vm2, %v758_v33, %v792_v42 }
 0x133   : > { %vm782_vm3 = vcmp.ge.f32.partialorder %v753_v40, 0.0  ;;  %v791_v43 = vmul.f32 %v789_v34, %v753_v40  ;;  %v798_v44 = vsel %vm781_vm0, %v750_v36, %v790_v41  ;;  %v2603_v41 = vld [vmem:[%s4049_s4 + $0x1] ss:$0 sm:$0xff] }
 0x134   : > { %2844 = vmatprep.mubr.msk.f32.mxu1 %vm815_vm1, %v798_v44  ;;  %v801_v54 = vsel %vm784_vm4, %v761_v38, %v793_v45  ;;  %v1122_v44 = vstv %s2616_s17 }
 0x135   : > { %v799_v47 = vsel %vm782_vm3, %v753_v40, %v791_v43  ;;  %v2834_v48 = vpop.f32.mrb[4].mxu0 }
 0x136   : > { %2845 = vmatmul.mubr.msk.f32.vlgmr.msra.gmra.mrb[0].mxu1 %vm815_vm1, %v799_v47  ;;  %v774_v50 = vadd.f32 %v2834_v48, %v2557_v31  ;;  %v765_v51 = vpop.f32.mrb[5].mxu0 }
 0x137   : > { %2857 = vmatpush3.bf16.msra.mxu1 %v3115_v30  ;;  %2847 = vmatprep.mubr.msk.f32.mxu1 %vm815_vm1, %v800_v49  ;;  %v766_v52 = vadd.f32 %v2557_v31, %v765_v51  ;;  %v2835_v53 = vpop.f32.mrb[6].mxu0  ;;  %v2668_v30 = vld [vmem:[%s4050_s5 + $0x40] sm:$0xff] }
 0x138   : > { %2858 = vmatprep.subr.bf16.mxu1 %v3116_v46  ;;  %v796_v55 = vmul.f32 %v789_v34, %v774_v50  ;;  %v777_v56 = vadd.f32 %v2835_v53, %v2557_v31  ;;  %v768_v58 = vpop.f32.mrb[7].mxu0  ;;  %vm787_vm5 = vcmp.ge.f32.partialorder %v774_v50, 0.0  ;;  %v2671_v53 = vld [vmem:[%s4050_s5 + $0x58] sm:$0xff] }
 0x139   : > { %vm785_vm6 = vcmp.ge.f32.partialorder %v766_v52, 0.0  ;;  %v794_v59 = vmul.f32 %v789_v34, %v766_v52  ;;  %v769_v60 = vadd.f32 %v2557_v31, %v768_v58  ;;  %v2669_v31 = vld [vmem:[%s4050_s5 + $0x48] sm:$0xff] }
 0x13a   : > { %2848 = vmatmul.mubr.msk.f32.gmra.mrb[2].mxu1 %vm815_vm1, %v801_v54  ;;  %v797_v61 = vmul.f32 %v789_v34, %v777_v56  ;;  %vm788_vm8 = vcmp.ge.f32.partialorder %v777_v56, 0.0  ;;  %v804_v1 = vsel %vm787_vm5, %v774_v50, %v796_v55  ;;  %v3020_v32 = vpack.c.bf16 %v2669_v31, %v2668_v30 }
 0x13b   : > { %2859 = vmatpush3.bf16.msra.mxu1 %v3116_v46  ;;  %vm786_vm7 = vcmp.ge.f32.partialorder %v769_v60, 0.0  ;;  %v795_v62 = vmul.f32 %v789_v34, %v769_v60  ;;  %v802_v63 = vsel %vm785_vm6, %v766_v52, %v794_v59  ;;  %v2670_v52 = vld [vmem:[%s4050_s5 + $0x50] sm:$0xff] }
 0x13c   : > { %2860 = vmatprep.subr.bf16.mxu1 %v3117_v57  ;;  %2850 = vmatprep.mubr.msk.f32.mxu1 %vm815_vm1, %v802_v63  ;;  %v805_v3 = vsel %vm788_vm8, %v777_v56, %v797_v61  ;;  %v3024_v58 = vpack.c.bf16 %v2671_v53, %v2670_v52 }
 0x13d   : > { %v803_v2 = vsel %vm786_vm7, %v769_v60, %v795_v62  ;;  %3021 = vmatprep.subr.bf16.mxu0 %v3020_v32 }
 0x13e   : > { %2851 = vmatmul.mubr.msk.f32.gmra.mrb[4].mxu1 %vm815_vm1, %v803_v2 }
 0x13f   : > { %2861 = vmatpush3.bf16.msra.mxu1 %v3117_v57  ;;  %2853 = vmatprep.mubr.msk.f32.mxu1 %vm815_vm1, %v804_v1 }
 0x140   : > { %2862 = vmatprep.subr.bf16.mxu1 %v3118_v0 }
 0x142   : > { %2854 = vmatmul.mubr.msk.f32.gmra.mrb[6].mxu1 %vm815_vm1, %v805_v3 }
 0x143   : > { %2863 = vmatpush3.bf16.msra.mxu1 %v3118_v0  ;;  %2872 = vmatprep.mubr.bf16.mxu1 %v3123_v4 }
 0x144   : > { %2864 = vmatprep.subr.bf16.mxu1 %v3119_v5 }
 0x147   : > { %2865 = vmatpush3.bf16.msra.mxu1 %v3119_v5 }
 0x148   : > { %2866 = vmatprep.subr.bf16.mxu1 %v3120_v6 }
 0x14b   : > { %2867 = vmatpush3.bf16.msra.mxu1 %v3120_v6 }
 0x14c   : > { %2868 = vmatprep.subr.bf16.mxu1 %v3121_v7 }
 0x14f   : > { %2869 = vmatpush3.bf16.msra.mxu1 %v3121_v7 }
 0x150   : > { %2870 = vmatprep.subr.bf16.mxu1 %v3122_v8 }
 0x153   : > { %2871 = vmatpush3.bf16.msra.mxu1 %v3122_v8 }
 0x154   : > { %2900 = vmatprep.subr.bf16.mxu1 %v3125_v9 }
 0x156   : > { %2873 = vmatmul.mubr.bf16.vlgmr.msra.gmra.mrb[8].mxu1 %v3124_v10 }
 0x157   : > { %2901 = vmatpush3.bf16.msra.mxu1 %v3125_v9  ;;  %2876 = vmatprep.mubr.bf16.mxu1 %v3127_v11 }
 0x158   : > { %2902 = vmatprep.subr.bf16.mxu1 %v3126_v12 }
 0x15b   : > { %2903 = vmatpush3.bf16.msra.mxu1 %v3126_v12 }
 0x15c   : > { %2904 = vmatprep.subr.bf16.mxu1 %v3129_v13 }
 0x15e   : > { %2877 = vmatmul.mubr.bf16.gmra.mrb[12].mxu1 %v3128_v14  ;;  %v2654_v14 = vld [vmem:[%s4049_s4 + $0x2] ss:$0 sm:$0xff] }
 0x15f   : > { %2905 = vmatpush3.bf16.msra.mxu1 %v3129_v13  ;;  %2916 = vmatprep.mubr.bf16.mxu1 %v3135_v15 }
 0x160   : > { %2906 = vmatprep.subr.bf16.mxu1 %v3130_v16 }
 0x163   : > { %2907 = vmatpush3.bf16.msra.mxu1 %v3130_v16 }
 0x164   : > { %2908 = vmatprep.subr.bf16.mxu1 %v3131_v17 }
 0x167   : > { %2909 = vmatpush3.bf16.msra.mxu1 %v3131_v17  ;;  %v1455_v17 = vstv %s2667_s30 }
 0x168   : > { %2910 = vmatprep.subr.bf16.mxu1 %v3132_v18 }
 0x16b   : > { %2911 = vmatpush3.bf16.msra.mxu1 %v3132_v18 }
 0x16c   : > { %2912 = vmatprep.subr.bf16.mxu1 %v3133_v19 }
 0x16f   : > { %2913 = vmatpush3.bf16.msra.mxu1 %v3133_v19 }
 0x170   : > { %2914 = vmatprep.subr.bf16.mxu1 %v3134_v20 }
 0x173   : > { %2915 = vmatpush3.bf16.msra.mxu1 %v3134_v20 }
 0x176   : > { %2917 = vmatmul.mubr.bf16.vlgmr.msra.gmra.mrb[16].mxu1 %v3136_v21 }
 0x177   : > { %2920 = vmatprep.mubr.bf16.mxu1 %v3137_v22 }
 0x17e   : > { %2921 = vmatmul.mubr.bf16.gmra.mrb[20].mxu1 %v3138_v23 }
 0x209   : > { %v3512_v33 = vpop.f32.mrb[0].mxu1 }
 0x20a   : > { %v3514_v34 = vpop.f32.mrb[1].mxu1 }
 0x20d   : > { %v3516_v35 = vpop.f32.mrb[2].mxu1 }
 0x20e   : > { %v3518_v36 = vpop.f32.mrb[3].mxu1 }
 0x211   : > { %v3520_v37 = vpop.f32.mrb[4].mxu1 }
 0x212   : > { %v3522_v38 = vpop.f32.mrb[5].mxu1 }
 0x215   : > { %v3524_v39 = vpop.f32.mrb[6].mxu1 }
 0x216   : > { %v3526_v40 = vpop.f32.mrb[7].mxu1 }
 0x229   : > { %v2874_v42 = vpop.f32.mrb[8].mxu1 }
 0x22a   : > { %v1091_v43 = vadd.f32 %v2874_v42, %v2603_v41  ;;  %v1082_v45 = vpop.f32.mrb[9].mxu1 }
 0x22b   : > { %v1083_v46 = vadd.f32 %v2603_v41, %v1082_v45  ;;  %v2875_v47 = vpop.f32.mrb[10].mxu1 }
 0x22c   : > { %v1094_v48 = vadd.f32 %v2875_v47, %v2603_v41  ;;  %v1085_v49 = vpop.f32.mrb[11].mxu1  ;;  %v1125_v54 = vmul.f32 %v1122_v44, %v1091_v43  ;;  %vm1116_vm10 = vcmp.ge.f32.partialorder %v1091_v43, 0.0 }
 0x22d   : > { %vm1114_vm9 = vcmp.ge.f32.partialorder %v1083_v46, 0.0  ;;  %v1123_v50 = vmul.f32 %v1122_v44, %v1083_v46  ;;  %v1086_v51 = vadd.f32 %v2603_v41, %v1085_v49 }
 0x22e   : > { %v1126_v57 = vmul.f32 %v1122_v44, %v1094_v48  ;;  %vm1117_vm12 = vcmp.ge.f32.partialorder %v1094_v48, 0.0  ;;  %v1133_v63 = vsel %vm1116_vm10, %v1091_v43, %v1125_v54  ;;  %vm1683_vm10 = vcmask 523264  }
 0x22f   : > { %vm1115_vm11 = vcmp.ge.f32.partialorder %v1086_v51, 0.0  ;;  %v1124_v55 = vmul.f32 %v1122_v44, %v1086_v51  ;;  %v1131_v56 = vsel %vm1114_vm9, %v1083_v46, %v1123_v50 }
 0x230   : > { %2888 = vmatprep.mubr.msk.f32.mxu0 %vm815_vm1, %v1131_v56  ;;  %v1134_v5 = vsel %vm1117_vm12, %v1094_v48, %v1126_v57  ;;  %v3559_v56 = vld [vmem:[%s4051_s6 + $0x1] ss:$0 sm:$0xff] }
 0x231   : > { %v1132_v59 = vsel %vm1115_vm11, %v1086_v51, %v1124_v55  ;;  %v2878_v60 = vpop.f32.mrb[12].mxu1  ;;  %vm1711_vm11 = vcmask 785408  }
 0x232   : > { %v1107_v61 = vadd.f32 %v2878_v60, %v2603_v41  ;;  %v1098_v62 = vpop.f32.mrb[13].mxu1  ;;  %2889 = vmatmul.mubr.msk.f32.vlgmr.msra.gmra.mrb[8].mxu0 %vm815_vm1, %v1132_v59  ;;  %v1692_v60 = vld [vmem:[%s4052_s7] sm:$0xff] }
 0x233   : > { %v1099_v0 = vadd.f32 %v2603_v41, %v1098_v62  ;;  %v2879_v1 = vpop.f32.mrb[14].mxu1  ;;  %2891 = vmatprep.mubr.msk.f32.mxu0 %vm815_vm1, %v1133_v63  ;;  %3023 = vmatpush3.bf16.msra.mxu0 %v3020_v32 }
 0x234   : > { %v1129_v2 = vmul.f32 %v1122_v44, %v1107_v61  ;;  %v1110_v3 = vadd.f32 %v2879_v1, %v2603_v41  ;;  %v1101_v4 = vpop.f32.mrb[15].mxu1  ;;  %3025 = vmatprep.subr.bf16.mxu0 %v3024_v58  ;;  %vm1120_vm13 = vcmp.ge.f32.partialorder %v1107_v61, 0.0 }
 0x235   : > { %vm1118_vm14 = vcmp.ge.f32.partialorder %v1099_v0, 0.0  ;;  %v1127_v6 = vmul.f32 %v1122_v44, %v1099_v0  ;;  %v1102_v7 = vadd.f32 %v2603_v41, %v1101_v4  ;;  %v1695_v4 = vld [vmem:[%s4052_s7 + $0x18] sm:$0xff] }
 0x236   : > { %2892 = vmatmul.mubr.msk.f32.gmra.mrb[10].mxu0 %vm815_vm1, %v1134_v5  ;;  %v1130_v8 = vmul.f32 %v1122_v44, %v1110_v3  ;;  %vm1121_vm0 = vcmp.ge.f32.partialorder %v1110_v3, 0.0  ;;  %v1137_v11 = vsel %vm1120_vm13, %v1107_v61, %v1129_v2  ;;  %v1693_v61 = vld [vmem:[%s4052_s7 + $0x8] sm:$0xff] }
 0x237   : > { %vm1119_vm15 = vcmp.ge.f32.partialorder %v1102_v7, 0.0  ;;  %v1128_v9 = vmul.f32 %v1122_v44, %v1102_v7  ;;  %v1135_v10 = vsel %vm1118_vm14, %v1099_v0, %v1127_v6  ;;  %3027 = vmatpush3.bf16.msra.mxu0 %v3024_v58  ;;  %v3028_v62 = vpack.c.bf16 %v1693_v61, %v1692_v60  ;;  %v1696_v6 = vld [vmem:[%s4052_s7 + $0x20] sm:$0xff] }
 0x238   : > { %2894 = vmatprep.mubr.msk.f32.mxu0 %vm815_vm1, %v1135_v10  ;;  %v1138_v13 = vsel %vm1121_vm0, %v1110_v3, %v1130_v8  ;;  %v1694_v3 = vld [vmem:[%s4052_s7 + $0x10] sm:$0xff]  ;;  %v1699_v10 = vld [vmem:[%s4052_s7 + $0x38] sm:$0xff] }
 0x239   : > { %v1136_v12 = vsel %vm1119_vm15, %v1102_v7, %v1128_v9  ;;  %3029 = vmatprep.subr.bf16.mxu0 %v3028_v62  ;;  %v3032_v5 = vpack.c.bf16 %v1695_v4, %v1694_v3  ;;  %v1697_v7 = vld [vmem:[%s4052_s7 + $0x28] sm:$0xff]  ;;  %v1698_v9 = vld [vmem:[%s4052_s7 + $0x30] sm:$0xff] }
 0x23a   : > { %2895 = vmatmul.mubr.msk.f32.gmra.mrb[12].mxu0 %vm815_vm1, %v1136_v12  ;;  %v3036_v8 = vpack.c.bf16 %v1697_v7, %v1696_v6 }
 0x23b   : > { %2897 = vmatprep.mubr.msk.f32.mxu0 %vm815_vm1, %v1137_v11 }
 0x23e   : > { %2898 = vmatmul.mubr.msk.f32.gmra.mrb[14].mxu0 %vm815_vm1, %v1138_v13 }
 0x249   : > { %v2918_v15 = vpop.f32.mrb[16].mxu1 }
 0x24a   : > { %v1424_v16 = vadd.f32 %v2918_v15, %v2654_v14  ;;  %v1415_v18 = vpop.f32.mrb[17].mxu1  ;;  %v3040_v15 = vpack.c.bf16 %v1699_v10, %v1698_v9 }
 0x24b   : > { %v1416_v19 = vadd.f32 %v2654_v14, %v1415_v18  ;;  %v2919_v20 = vpop.f32.mrb[18].mxu1  ;;  %v1701_v18 = vld [vmem:[%s4052_s7 + $0x48] sm:$0xff] }
 0x24c   : > { %v1427_v21 = vadd.f32 %v2919_v20, %v2654_v14  ;;  %v1418_v22 = vpop.f32.mrb[19].mxu1  ;;  %v1458_v25 = vmul.f32 %v1455_v17, %v1424_v16  ;;  %vm1449_vm3 = vcmp.ge.f32.partialorder %v1424_v16, 0.0 }
 0x24d   : > { %vm1447_vm2 = vcmp.ge.f32.partialorder %v1416_v19, 0.0  ;;  %v1456_v23 = vmul.f32 %v1455_v17, %v1416_v19  ;;  %v1419_v24 = vadd.f32 %v2654_v14, %v1418_v22 }
 0x24e   : > { %v1459_v28 = vmul.f32 %v1455_v17, %v1427_v21  ;;  %vm1450_vm5 = vcmp.ge.f32.partialorder %v1427_v21, 0.0  ;;  %v1466_v41 = vsel %vm1449_vm3, %v1424_v16, %v1458_v25 }
 0x24f   : > { %vm1448_vm4 = vcmp.ge.f32.partialorder %v1419_v24, 0.0  ;;  %v1457_v26 = vmul.f32 %v1455_v17, %v1419_v24  ;;  %v1464_v27 = vsel %vm1447_vm2, %v1416_v19, %v1456_v23  ;;  %v1702_v23 = vld [vmem:[%s4052_s7 + $0x50] sm:$0xff] }
 0x250   : > { %2932 = vmatprep.mubr.msk.f32.mxu0 %vm815_vm1, %v1464_v27  ;;  %v1467_v46 = vsel %vm1450_vm5, %v1427_v21, %v1459_v28  ;;  %vm2320_vm5 = vcmask 392192  }
 0x251   : > { %v1465_v29 = vsel %vm1448_vm4, %v1419_v24, %v1457_v26  ;;  %v2922_v30 = vpop.f32.mrb[20].mxu1  ;;  %v1703_v24 = vld [vmem:[%s4052_s7 + $0x58] sm:$0xff]  ;;  %v2672_v26 = vld [vmem:[%s4051_s6 + $0x2] ss:$0 sm:$0xff] }
 0x252   : > { %v1440_v31 = vadd.f32 %v2922_v30, %v2654_v14  ;;  %v1431_v32 = vpop.f32.mrb[21].mxu1  ;;  %2933 = vmatmul.mubr.msk.f32.vlgmr.msra.gmra.mrb[16].mxu0 %vm815_vm1, %v1465_v29  ;;  %v3048_v25 = vpack.c.bf16 %v1703_v24, %v1702_v23 }
 0x253   : > { %v1432_v42 = vadd.f32 %v2654_v14, %v1431_v32  ;;  %v2923_v43 = vpop.f32.mrb[22].mxu1  ;;  %2935 = vmatprep.mubr.msk.f32.mxu0 %vm815_vm1, %v1466_v41  ;;  %3031 = vmatpush3.bf16.msra.mxu0 %v3028_v62 }
 0x254   : > { %vm1453_vm6 = vcmp.ge.f32.partialorder %v1440_v31, 0.0  ;;  %v1462_v44 = vmul.f32 %v1455_v17, %v1440_v31  ;;  %v1434_v45 = vpop.f32.mrb[23].mxu1  ;;  %v1443_v48 = vadd.f32 %v2923_v43, %v2654_v14  ;;  %3033 = vmatprep.subr.bf16.mxu0 %v3032_v5 }
 0x255   : > { %vm1451_vm7 = vcmp.ge.f32.partialorder %v1432_v42, 0.0  ;;  %v1460_v47 = vmul.f32 %v1455_v17, %v1432_v42  ;;  %v1435_v49 = vadd.f32 %v2654_v14, %v1434_v45 }
 0x256   : > { %2936 = vmatmul.mubr.msk.f32.gmra.mrb[18].mxu0 %vm815_vm1, %v1467_v46  ;;  %v1470_v52 = vsel %vm1453_vm6, %v1440_v31, %v1462_v44  ;;  %v1463_v53 = vmul.f32 %v1455_v17, %v1443_v48  ;;  %vm1454_vm9 = vcmp.ge.f32.partialorder %v1443_v48, 0.0 }
 0x257   : > { %vm1452_vm8 = vcmp.ge.f32.partialorder %v1435_v49, 0.0  ;;  %v1461_v50 = vmul.f32 %v1455_v17, %v1435_v49  ;;  %v1468_v51 = vsel %vm1451_vm7, %v1432_v42, %v1460_v47  ;;  %3035 = vmatpush3.bf16.msra.mxu0 %v3032_v5  ;;  %v1700_v17 = vld [vmem:[%s4052_s7 + $0x40] sm:$0xff] }
 0x258   : > { %2938 = vmatprep.mubr.msk.f32.mxu0 %vm815_vm1, %v1468_v51  ;;  %v1471_v55 = vsel %vm1454_vm9, %v1443_v48, %v1463_v53  ;;  %3037 = vmatprep.subr.bf16.mxu0 %v3036_v8  ;;  %v3044_v21 = vpack.c.bf16 %v1701_v18, %v1700_v17 }
 0x259   : > { %v1469_v54 = vsel %vm1452_vm8, %v1435_v49, %v1461_v50 }
 0x25a   : > { %2939 = vmatmul.mubr.msk.f32.gmra.mrb[20].mxu0 %vm815_vm1, %v1469_v54 }
 0x25b   : > { %2941 = vmatprep.mubr.msk.f32.mxu0 %vm815_vm1, %v1470_v52  ;;  %3039 = vmatpush3.bf16.msra.mxu0 %v3036_v8  ;;  %v3667_v52 = vld [vmem:[%s4055_s10] ss:$0 sm:$0xff] }
 0x25c   : > { %3041 = vmatprep.subr.bf16.mxu0 %v3040_v15 }
 0x25e   : > { %2942 = vmatmul.mubr.msk.f32.gmra.mrb[22].mxu0 %vm815_vm1, %v1471_v55 }
 0x25f   : > { %3043 = vmatpush3.bf16.msra.mxu0 %v3040_v15 }
 0x260   : > { %3045 = vmatprep.subr.bf16.mxu0 %v3044_v21 }
 0x263   : > { %3047 = vmatpush3.bf16.msra.mxu0 %v3044_v21 }
 0x264   : > { %3049 = vmatprep.subr.bf16.mxu0 %v3048_v25 }
 0x267   : > { %3051 = vmatpush3.bf16.msra.mxu0 %v3048_v25 }
 0x305   : > { %v2890_v57 = vpop.f32.mrb[8].mxu0 }
 0x306   : > { %v3562_v58 = vadd.f32 %v2890_v57, %v3559_v56  ;;  %v1239_v59 = vpop.f32.mrb[9].mxu0 }
 0x307   : > { %v3573_v0 = vadd.f32 %v3559_v56, %v1239_v59 }
 0x308   : > { %1621 = vrot.lane.b32.xlu0 %v3562_v58, %s3247_s21  ;;  %v1972_v55 = vmul.f32 %v3667_v52, %v3562_v58 }
 0x309   : > { %v2893_v63 = vpop.f32.mrb[10].mxu0  ;;  %v1971_v53 = vmul.f32 %v3667_v52, %v3573_v0 }
 0x30a   : > { %v3576_v1 = vadd.f32 %v2893_v63, %v3559_v56  ;;  %v1249_v2 = vpop.f32.mrb[11].mxu0  ;;  %v1982_v60 = vsel %vm815_vm1, %v1972_v55, 0.0 }
 0x30b   : > { %v3601_v12 = vadd.f32 %v3559_v56, %v1249_v2  ;;  %v1979_v54 = vsel %vm815_vm1, %v1971_v53, 0.0 }
 0x30c   : > { %1625 = vrot.lane.b32.xlu1 %v3576_v1, %s3247_s21  ;;  %1619 = vrot.lane.b32.xlu0 %v3573_v0, %s3247_s21 }
 0x30d   : > { %v2896_v11 = vpop.f32.mrb[12].mxu0  ;;  %v1973_v15 = vmul.f32 %v3667_v52, %v3601_v12 }
 0x30e   : > { %v3604_v13 = vadd.f32 %v2896_v11, %v3559_v56  ;;  %v1259_v14 = vpop.f32.mrb[13].mxu0 }
 0x30f   : > { %v3611_v16 = vadd.f32 %v3559_v56, %v1259_v14 }
 0x310   : > { %1629 = vrot.lane.b32.xlu1 %v3604_v13, %s3247_s21  ;;  %1623 = vrot.lane.b32.xlu0 %v3601_v12, %s3247_s21 }
 0x311   : > { %v2899_v19 = vpop.f32.mrb[14].mxu0 }
 0x312   : > { %v1269_v20 = vpop.f32.mrb[15].mxu0  ;;  %v3645_v43 = vadd.f32 %v2899_v19, %v3559_v56  ;;  %v1976_v19 = vmul.f32 %v3667_v52, %v3604_v13 }
 0x313   : > { %v3622_v22 = vadd.f32 %v3559_v56, %v1269_v20  ;;  %v3677_v56 = vld [vmem:[%s4051_s6] ss:$0 sm:$0xff] }
 0x314   : > { %1627 = vrot.lane.b32.xlu0 %v3611_v16, %s3247_s21  ;;  %4064 = vst [vmem:[#allocation6_spill] sm:$0xff] %v3645_v43  ;;  %v3681_v57 = vadd.f32 %v3677_v56, %v3514_v34  ;;  %v3685_v59 = vadd.f32 %v3677_v56, %v3518_v36  ;;  %v3692_v62 = vadd.f32 %v3512_v33, %v3677_v56  ;;  %v1994_v23 = vsel %vm815_vm1, %v1976_v19, 0.0 }
 0x315   : > { %v1974_v33 = vmul.f32 %v3667_v52, %v3576_v1  ;;  %v3708_v6 = vadd.f32 %v3677_v56, %v3522_v38  ;;  %v3717_v10 = vadd.f32 %v3516_v35, %v3677_v56  ;;  %v1985_v35 = vsel %vm815_vm1, %v1973_v15, 0.0 }
 0x316   : > { %v1916_v34 = vmul.f32 %v3667_v52, %v3685_v59  ;;  %v1914_v2 = vmul.f32 %v3667_v52, %v3681_v57  ;;  %v1915_v36 = vmul.f32 %v3667_v52, %v3692_v62  ;;  %v3734_v21 = vadd.f32 %v3677_v56, %v3526_v40 }
 0x317   : > { %v1988_v7 = vsel %vm815_vm1, %v1974_v33, 0.0  ;;  %v1918_v38 = vmul.f32 %v3667_v52, %v3708_v6  ;;  %v1917_v17 = vmul.f32 %v3667_v52, %v3717_v10 }
 0x318   : > { %1631 = vrot.lane.b32.xlu0 %v3622_v22, %s3247_s21  ;;  %v1928_v3 = vsel %vm815_vm1, %v1916_v34, 0.0  ;;  %v1922_v4 = vsel %vm815_vm1, %v1914_v2, 0.0  ;;  %v1925_v5 = vsel %vm815_vm1, %v1915_v36, 0.0  ;;  %v1920_v40 = vmul.f32 %v3667_v52, %v3734_v21 }
 0x319   : > { %v1934_v18 = vsel %vm815_vm1, %v1918_v38, 0.0  ;;  %v1931_v20 = vsel %vm815_vm1, %v1917_v17, 0.0 }
 0x325   : > { %v2934_v27 = vpop.f32.mrb[16].mxu0 }
 0x326   : > { %v3635_v28 = vadd.f32 %v2934_v27, %v2672_v26  ;;  %v1572_v29 = vpop.f32.mrb[17].mxu0 }
 0x327   : > { %v3638_v31 = vadd.f32 %v2672_v26, %v1572_v29 }
 0x328   : > { %1653 = vrot.lane.b32.xlu1 %v3635_v28, %s3248_s16  ;;  %v2028_v61 = vmul.f32 %v3667_v52, %v3635_v28 }
 0x329   : > { %v2937_v30 = vpop.f32.mrb[18].mxu0  ;;  %v2027_v9 = vmul.f32 %v3667_v52, %v3638_v31 }
 0x32a   : > { %v1582_v32 = vpop.f32.mrb[19].mxu0  ;;  %v3652_v47 = vadd.f32 %v2937_v30, %v2672_v26  ;;  %v2038_v63 = vsel %vm815_vm1, %v2028_v61, 0.0  ;;  %v1975_v30 = vmul.f32 %v3667_v52, %v3611_v16 }
 0x32b   : > { %v3640_v41 = vadd.f32 %v2672_v26, %v1582_v32  ;;  %v2035_v14 = vsel %vm815_vm1, %v2027_v9, 0.0  ;;  %v1940_v32 = vsel %vm815_vm1, %v1920_v40, 0.0 }
 0x32c   : > { %1651 = vrot.lane.b32.xlu1 %v3638_v31, %s3248_s16  ;;  %v2030_v8 = vmul.f32 %v3667_v52, %v3652_v47 }
 0x32d   : > { %v2940_v42 = vpop.f32.mrb[20].mxu0  ;;  %1655 = vrot.lane.b32.xlu0 %v3640_v41, %s3248_s16  ;;  %v2029_v25 = vmul.f32 %v3667_v52, %v3640_v41 }
 0x32e   : > { %v1592_v44 = vpop.f32.mrb[21].mxu0  ;;  %v3658_v50 = vadd.f32 %v2940_v42, %v2672_v26  ;;  %v2044_v11 = vsel %vm815_vm1, %v2030_v8, 0.0  ;;  %v1991_v42 = vsel %vm815_vm1, %v1975_v30, 0.0 }
 0x32f   : > { %v3647_v45 = vadd.f32 %v2672_v26, %v1592_v44  ;;  %v2041_v29 = vsel %vm815_vm1, %v2029_v25, 0.0 }
 0x330   : > { %1633 = vrot.lane.b32.xlu1 %v3645_v43, %s3247_s21  ;;  %v2032_v24 = vmul.f32 %v3667_v52, %v3658_v50 }
 0x331   : > { %v2943_v46 = vpop.f32.mrb[22].mxu0  ;;  %1659 = vrot.lane.b32.xlu0 %v3647_v45, %s3248_s16  ;;  %v2031_v53 = vmul.f32 %v3667_v52, %v3647_v45 }
 0x332   : > { %v1602_v48 = vpop.f32.mrb[23].mxu0  ;;  %v3661_v51 = vadd.f32 %v2943_v46, %v2672_v26  ;;  %v2050_v27 = vsel %vm815_vm1, %v2032_v24, 0.0 }
 0x333   : > { %v3654_v49 = vadd.f32 %v2672_v26, %v1602_v48  ;;  %v3743_v26 = vadd.f32 %v3520_v37, %v3677_v56  ;;  %v1978_v37 = vmul.f32 %v3667_v52, %v3645_v43  ;;  %v2047_v55 = vsel %vm815_vm1, %v2031_v53, 0.0 }
 0x334   : > { %1657 = vrot.lane.b32.xlu1 %v3652_v47, %s3248_s16  ;;  %4065 = vst [vmem:[#allocation7_spill] sm:$0xff] %v3661_v51 }
 0x335   : > { %1663 = vrot.lane.b32.xlu0 %v3654_v49, %s3248_s16  ;;  %v1919_v44 = vmul.f32 %v3667_v52, %v3743_v26  ;;  %v2000_v46 = vsel %vm815_vm1, %v1978_v37, 0.0 }
 0x337   : > { %v1937_v48 = vsel %vm815_vm1, %v1919_v44, 0.0 }
 0x338   : > { %1661 = vrot.lane.b32.xlu1 %v3658_v50, %s3248_s16 }
 0x33c   : > { %1665 = vrot.lane.b32.xlu1 %v3661_v51, %s3248_s16  ;;  %s2554_s16 = sshll.u32 %s4072_s22, 3 }
 0x33d   : > { %s605_s24 = scalar_lea.vmem %s4047_s2, %s2554_s16  ;;  %s611_s17 = scalar_lea.vmem %s4058_s13, %s2554_s16 }
 0x354   : > { %1980 = vadd.xlane.f32.xlu0 %v1979_v54  ;;  %v3763_v54 = vadd.f32 %v3524_v39, %v3677_v56 }
 0x356   : > { %v1921_v34 = vmul.f32 %v3667_v52, %v3763_v54 }
 0x358   : > { %1983 = vadd.xlane.f32.xlu0 %v1982_v60  ;;  %v1977_v60 = vmul.f32 %v3667_v52, %v3622_v22  ;;  %v1943_v2 = vsel %vm815_vm1, %v1921_v34, 0.0 }
 0x35c   : > { %2039 = vadd.xlane.f32.xlu0 %v2038_v63  ;;  %v1997_v63 = vsel %vm815_vm1, %v1977_v60, 0.0 }
 0x360   : > { %1929 = vadd.xlane.f32.xlu0 %v1928_v3  ;;  %1923 = vadd.xlane.f32.xlu1 %v1922_v4 }
 0x364   : > { %1989 = vadd.xlane.f32.xlu0 %v1988_v7  ;;  %1926 = vadd.xlane.f32.xlu1 %v1925_v5 }
 0x368   : > { %2045 = vadd.xlane.f32.xlu0 %v2044_v11  ;;  %2036 = vadd.xlane.f32.xlu1 %v2035_v14 }
 0x36c   : > { %1935 = vadd.xlane.f32.xlu0 %v1934_v18  ;;  %1986 = vadd.xlane.f32.xlu1 %v1985_v35 }
 0x370   : > { %1995 = vadd.xlane.f32.xlu0 %v1994_v23  ;;  %1932 = vadd.xlane.f32.xlu1 %v1931_v20 }
 0x374   : > { %2051 = vadd.xlane.f32.xlu0 %v2050_v27  ;;  %2042 = vadd.xlane.f32.xlu1 %v2041_v29 }
 0x378   : > { %1941 = vadd.xlane.f32.xlu0 %v1940_v32  ;;  %1992 = vadd.xlane.f32.xlu1 %v1991_v42 }
 0x37a   : > { %v1622_v61 = vpop.permute.xlu0 %1621 }
 0x37b   : > { %v1676_v9 = vsel %vm815_vm1, %v3692_v62, %v1622_v61 }
 0x37c   : > { %2001 = vadd.xlane.f32.xlu0 %v2000_v46  ;;  %1938 = vadd.xlane.f32.xlu1 %v1937_v48  ;;  %v2681_v48 = vld [vmem:[%s4053_s8] ss:$0 sm:$0xff] }
 0x37e   : > { %v1620_v36 = vpop.permute.xlu0 %1619  ;;  %v1626_v39 = vpop.permute.xlu1 %1625 }
 0x37f   : > { %v1675_v7 = vsel %vm815_vm1, %v3681_v57, %v1620_v36  ;;  %v1678_v19 = vsel %vm815_vm1, %v3717_v10, %v1626_v39 }
 0x380   : > { %2048 = vadd.xlane.f32.xlu1 %v2047_v55  ;;  %v1850_v55 = vstv %s2690_s19 }
 0x382   : > { %v1624_v3 = vpop.permute.xlu0 %1623  ;;  %v1630_v4 = vpop.permute.xlu1 %1629 }
 0x383   : > { %v1677_v11 = vsel %vm815_vm1, %v3685_v59, %v1624_v3  ;;  %v1680_v29 = vsel %vm815_vm1, %v3743_v26, %v1630_v4 }
 0x384   : > { %1998 = vadd.xlane.f32.xlu1 %v1997_v63 }
 0x386   : > { %v1628_v56 = vpop.permute.xlu0 %1627 }
 0x387   : > { %v1679_v23 = vsel %vm815_vm1, %v3708_v6, %v1628_v56 }
 0x388   : > { %1944 = vadd.xlane.f32.xlu1 %v1943_v2  ;;  %v2692_v2 = vld [vmem:[%s4054_s9] ss:$0 sm:$0xff] }
 0x38a   : > { %v1632_v5 = vpop.permute.xlu0 %1631 }
 0x38b   : > { %v1681_v30 = vsel %vm815_vm1, %v3734_v21, %v1632_v5 }
 0x39a   : > { %v1654_v33 = vpop.permute.xlu1 %1653 }
 0x39b   : > { %v1685_v15 = vsel %vm1683_vm10, %v1676_v9, %v1654_v33 }
 0x39e   : > { %v1652_v8 = vpop.permute.xlu1 %1651 }
 0x39f   : > { %v1684_v14 = vsel %vm1683_vm10, %v1675_v7, %v1652_v8  ;;  %v1656_v38 = vpop.permute.xlu0 %1655 }
 0x3a0   : > { %v1686_v17 = vsel %vm1683_vm10, %v1677_v11, %v1656_v38  ;;  %2968 = vmatprep.mubr.msk.f32.mxu0 %vm1711_vm11, %v1684_v14 }
 0x3a1   : > { %2969 = vmatmul.mubr.msk.f32.vlgmr.msra.gmra.mrb[24].mxu0 %vm1711_vm11, %v1685_v15 }
 0x3a2   : > { %v1634_v18 = vpop.permute.xlu1 %1633  ;;  %2971 = vmatprep.mubr.msk.f32.mxu0 %vm1711_vm11, %v1686_v17 }
 0x3a3   : > { %v1660_v35 = vpop.permute.xlu0 %1659  ;;  %v1682_v37 = vsel %vm815_vm1, %v3763_v54, %v1634_v18 }
 0x3a4   : > { %v1688_v25 = vsel %vm1683_vm10, %v1679_v23, %v1660_v35 }
 0x3a6   : > { %v1658_v20 = vpop.permute.xlu1 %1657 }
 0x3a7   : > { %v1687_v24 = vsel %vm1683_vm10, %v1678_v19, %v1658_v20  ;;  %v1664_v27 = vpop.permute.xlu0 %1663 }
 0x3a8   : > { %2972 = vmatmul.mubr.msk.f32.gmra.mrb[26].mxu0 %vm1711_vm11, %v1687_v24  ;;  %v1690_v42 = vsel %vm1683_vm10, %v1681_v30, %v1664_v27 }
 0x3a9   : > { %2974 = vmatprep.mubr.msk.f32.mxu0 %vm1711_vm11, %v1688_v25 }
 0x3aa   : > { %v1662_v40 = vpop.permute.xlu1 %1661 }
 0x3ab   : > { %v1689_v32 = vsel %vm1683_vm10, %v1680_v29, %v1662_v40 }
 0x3ac   : > { %2975 = vmatmul.mubr.msk.f32.gmra.mrb[28].mxu0 %vm1711_vm11, %v1689_v32 }
 0x3ad   : > { %2977 = vmatprep.mubr.msk.f32.mxu0 %vm1711_vm11, %v1690_v42 }
 0x3ae   : > { %v1666_v44 = vpop.permute.xlu1 %1665 }
 0x3af   : > { %v1691_v46 = vsel %vm1683_vm10, %v1682_v37, %v1666_v44 }
 0x3b0   : > { %2978 = vmatmul.mubr.msk.f32.gmra.mrb[30].mxu0 %vm1711_vm11, %v1691_v46 }
 0x474   : > { %v2970_v53 = vpop.f32.mrb[24].mxu0 }
 0x475   : > { %v1808_v60 = vadd.f32 %v2970_v53, %v2681_v48  ;;  %v1802_v61 = vpop.f32.mrb[25].mxu0 }
 0x476   : > { %v1803_v63 = vadd.f32 %v2681_v48, %v1802_v61 }
 0x477   : > { %vm1843_vm12 = vcmp.ge.f32.partialorder %v1808_v60, 0.0  ;;  %v1852_v34 = vmul.f32 %v1850_v55, %v1808_v60 }
 0x478   : > { %vm1842_vm13 = vcmp.ge.f32.partialorder %v1803_v63, 0.0  ;;  %v1851_v36 = vmul.f32 %v1850_v55, %v1803_v63 }
 0x479   : > { %v1860_v3 = vsel %vm1843_vm12, %v1808_v60, %v1852_v34 }
 0x47a   : > { %v1877_v39 = vmul.f32 %v2692_v2, %v1860_v3  ;;  %v1859_v56 = vsel %vm1842_vm13, %v1803_v63, %v1851_v36 }
 0x47b   : > { %v2973_v4 = vpop.f32.mrb[26].mxu0  ;;  %v1876_v8 = vmul.f32 %v2692_v2, %v1859_v56 }
 0x47c   : > { %v1818_v33 = vadd.f32 %v2973_v4, %v2681_v48  ;;  %v1812_v5 = vpop.f32.mrb[27].mxu0  ;;  %v1887_v7 = vsel %vm815_vm1, %v1877_v39, 0.0 }
 0x47d   : > { %v1813_v9 = vadd.f32 %v2681_v48, %v1812_v5  ;;  %1888 = vadd.xlane.f32.xlu0 %v1887_v7  ;;  %v1884_v18 = vsel %vm815_vm1, %v1876_v8, 0.0  ;;  %v2033_v5 = vmul.f32 %v3667_v52, %v3654_v49 }
 0x47e   : > { %vm1845_vm14 = vcmp.ge.f32.partialorder %v1818_v33, 0.0  ;;  %v1854_v11 = vmul.f32 %v1850_v55, %v1818_v33 }
 0x47f   : > { %vm1844_vm15 = vcmp.ge.f32.partialorder %v1813_v9, 0.0  ;;  %v1853_v14 = vmul.f32 %v1850_v55, %v1813_v9  ;;  %v2976_v38 = vpop.f32.mrb[28].mxu0  ;;  %v2053_v7 = vsel %vm815_vm1, %v2033_v5, 0.0 }
 0x480   : > { %v1828_v15 = vadd.f32 %v2976_v38, %v2681_v48  ;;  %v1822_v17 = vpop.f32.mrb[29].mxu0  ;;  %v1862_v35 = vsel %vm1845_vm14, %v1818_v33, %v1854_v11  ;;  %v2262_v11 = vld [vmem:[%s605_s24 + $0x18] sm:$0xff]  ;;  %v2264_v38 = vld [vmem:[%s605_s24 + $0x28] sm:$0xff] }
 0x481   : > { %v1823_v19 = vadd.f32 %v2681_v48, %v1822_v17  ;;  %1885 = vadd.xlane.f32.xlu0 %v1884_v18  ;;  %v1861_v20 = vsel %vm1844_vm15, %v1813_v9, %v1853_v14  ;;  %v1879_v23 = vmul.f32 %v2692_v2, %v1862_v35  ;;  %v2260_v9 = vld [vmem:[%s605_s24 + $0x8] sm:$0xff]  ;;  %v2263_v14 = vld [vmem:[%s605_s24 + $0x20] sm:$0xff]  ;;  %v2266_v17 = vld [vmem:[%s605_s24 + $0x38] sm:$0xff] }
 0x482   : > { %vm1847_vm0 = vcmp.ge.f32.partialorder %v1828_v15, 0.0  ;;  %v1856_v24 = vmul.f32 %v1850_v55, %v1828_v15  ;;  %v1878_v25 = vmul.f32 %v2692_v2, %v1861_v20  ;;  %v2307_v18 = vld [vmem:[%s4056_s11] sm:$0xff]  ;;  %v2308_v35 = vld [vmem:[%s4056_s11 + $0x8] sm:$0xff] }
 0x483   : > { %vm1846_vm2 = vcmp.ge.f32.partialorder %v1823_v19, 0.0  ;;  %v1855_v27 = vmul.f32 %v1850_v55, %v1823_v19  ;;  %v2979_v29 = vpop.f32.mrb[30].mxu0  ;;  %v1893_v40 = vsel %vm815_vm1, %v1879_v23, 0.0  ;;  %v3052_v20 = vpack.c.bf16 %v2308_v35, %v2307_v18  ;;  %v2309_v23 = vld [vmem:[%s4056_s11 + $0x10] sm:$0xff] }
 0x484   : > { %v1838_v30 = vadd.f32 %v2979_v29, %v2681_v48  ;;  %v1832_v32 = vpop.f32.mrb[31].mxu0  ;;  %v1890_v42 = vsel %vm815_vm1, %v1878_v25, 0.0  ;;  %v1864_v37 = vsel %vm1847_vm0, %v1828_v15, %v1856_v24  ;;  %v2265_v15 = vld [vmem:[%s605_s24 + $0x30] sm:$0xff]  ;;  %v2310_v24 = vld [vmem:[%s4056_s11 + $0x18] sm:$0xff]  ;;  %v2311_v29 = vld [vmem:[%s4056_s11 + $0x20] sm:$0xff] }
 0x485   : > { %v1833_v44 = vadd.f32 %v2681_v48, %v1832_v32  ;;  %1891 = vadd.xlane.f32.xlu1 %v1890_v42  ;;  %1894 = vadd.xlane.f32.xlu0 %v1893_v40  ;;  %v1863_v46 = vsel %vm1846_vm2, %v1823_v19, %v1855_v27  ;;  %v1881_v53 = vmul.f32 %v2692_v2, %v1864_v37  ;;  %v1981_v19 = vpop.xlane.xlu0 %1980  ;;  %v2312_v40 = vld [vmem:[%s4056_s11 + $0x28] sm:$0xff]  ;;  %v1924_v32 = vpop.xlane.xlu1 %1923 }
 0x486   : > { %vm1849_vm3 = vcmp.ge.f32.partialorder %v1838_v30, 0.0  ;;  %v1858_v60 = vmul.f32 %v1850_v55, %v1838_v30  ;;  %v1880_v61 = vmul.f32 %v2692_v2, %v1863_v46  ;;  %3053 = vmatprep.subr.bf16.mxu1 %v3052_v20  ;;  %v3056_v25 = vpack.c.bf16 %v2310_v24, %v2309_v23 }
 0x487   : > { %vm1848_vm4 = vcmp.ge.f32.partialorder %v1833_v44, 0.0  ;;  %v1857_v63 = vmul.f32 %v1850_v55, %v1833_v44  ;;  %v1899_v34 = vsel %vm815_vm1, %v1881_v53, 0.0  ;;  %v2034_v55 = vmul.f32 %v3667_v52, %v3661_v51  ;;  %v2259_v52 = vld [vmem:[%s605_s24] sm:$0xff]  ;;  %3055 = vmatpush3.bf16.msra.mxu1 %v3052_v20 }
 0x488   : > { %v1896_v36 = vsel %vm815_vm1, %v1880_v61, 0.0  ;;  %v1866_v3 = vsel %vm1849_vm3, %v1838_v30, %v1858_v60  ;;  %3057 = vmatprep.subr.bf16.mxu1 %v3056_v25  ;;  %v3060_v30 = vpack.c.bf16 %v2312_v40, %v2311_v29 }
 0x489   : > { %1897 = vadd.xlane.f32.xlu1 %v1896_v36  ;;  %1900 = vadd.xlane.f32.xlu0 %v1899_v34  ;;  %v1865_v39 = vsel %vm1848_vm4, %v1833_v44, %v1857_v63  ;;  %v1883_v56 = vmul.f32 %v2692_v2, %v1866_v3  ;;  %v2056_v8 = vsel %vm815_vm1, %v2034_v55, 0.0  ;;  %v1984_v27 = vpop.xlane.xlu0 %1983  ;;  %v1927_v37 = vpop.xlane.xlu1 %1926 }
 0x48a   : > { %v1882_v48 = vmul.f32 %v2692_v2, %v1865_v39  ;;  %v2261_v2 = vld [vmem:[%s605_s24 + $0x10] sm:$0xff] }
 0x48b   : > { %v1905_v4 = vsel %vm815_vm1, %v1883_v56, 0.0  ;;  %3059 = vmatpush3.bf16.msra.mxu1 %v3056_v25 }
 0x48c   : > { %v1902_v33 = vsel %vm815_vm1, %v1882_v48, 0.0  ;;  %3061 = vmatprep.subr.bf16.mxu1 %v3060_v30 }
 0x48d   : > { %1903 = vadd.xlane.f32.xlu1 %v1902_v33  ;;  %1906 = vadd.xlane.f32.xlu0 %v1905_v4  ;;  %v2040_v42 = vpop.xlane.xlu0 %2039  ;;  %v2037_v46 = vpop.xlane.xlu1 %2036 }
 0x48f   : > { %3063 = vmatpush3.bf16.msra.mxu1 %v3060_v30 }
 0x491   : > { %2054 = vadd.xlane.f32.xlu1 %v2053_v7  ;;  %2057 = vadd.xlane.f32.xlu0 %v2056_v8  ;;  %v1930_v44 = vpop.xlane.xlu0 %1929  ;;  %v1987_v60 = vpop.xlane.xlu1 %1986  ;;  %v3878_v7 = vstv %s2691_s27 }
 0x495   : > { %v1990_v53 = vpop.xlane.xlu0 %1989  ;;  %v1933_v63 = vpop.xlane.xlu1 %1932 }
 0x499   : > { %v2046_v61 = vpop.xlane.xlu0 %2045  ;;  %v2043_v36 = vpop.xlane.xlu1 %2042 }
 0x49d   : > { %v3860_v34 = vpop.xlane.xlu0 %1935  ;;  %v3864_v39 = vpop.xlane.xlu1 %1992 }
 0x4a1   : > { %v3862_v3 = vpop.xlane.xlu0 %1995  ;;  %v3868_v48 = vpop.xlane.xlu1 %1938 }
 0x4a2   : > { %2275 = vrot.lane.b32.xlu1 %v2259_v52, %s3247_s21 }
 0x4a5   : > { %v3866_v56 = vpop.xlane.xlu0 %2051  ;;  %v3872_v33 = vpop.xlane.xlu1 %2048 }
 0x4a6   : > { %2279 = vrot.lane.b32.xlu1 %v2261_v2, %s3247_s21 }
 0x4a7   : > { %2277 = vrot.lane.b32.xlu0 %v2260_v9, %s3247_s21 }
 0x4a9   : > { %v3870_v4 = vpop.xlane.xlu0 %1941  ;;  %v3876_v55 = vpop.xlane.xlu1 %1998 }
 0x4aa   : > { %2281 = vrot.lane.b32.xlu1 %v2262_v11, %s3247_s21 }
 0x4ab   : > { %2283 = vrot.lane.b32.xlu0 %v2263_v14, %s3247_s21 }
 0x4ad   : > { %v3874_v5 = vpop.xlane.xlu0 %2001 }
 0x4ae   : > { %2285 = vrot.lane.b32.xlu1 %v2264_v38, %s3247_s21 }
 0x4af   : > { %2287 = vrot.lane.b32.xlu0 %v2265_v15, %s3247_s21  ;;  %v3883_v15 = vpop.xlane.xlu1 %1944 }
 0x4b2   : > { %2289 = vrot.lane.b32.xlu1 %v2266_v17, %s3247_s21 }
 0x50a   : > { %v1889_v8 = vpop.xlane.xlu0 %1888 }
 0x50b   : > { %v1947_v52 = vadd.f32 %v1927_v37, %v1889_v8  ;;  %v2004_v2 = vadd.f32 %v1984_v27, %v1889_v8  ;;  %v2060_v9 = vadd.f32 %v2040_v42, %v1889_v8 }
 0x50d   : > { %v1956_v11 = vadd.f32 %v3878_v7, %v1947_v52  ;;  %v2012_v14 = vadd.f32 %v2004_v2, %v3878_v7  ;;  %v2068_v38 = vadd.f32 %v2060_v9, %v3878_v7 }
 0x50e   : > { %v1886_v17 = vpop.xlane.xlu0 %1885 }
 0x50f   : > { %v1964_v18 = vmax.f32 %v1956_v11, 0.0  ;;  %v2020_v35 = vmax.f32 %v2012_v14, 0.0  ;;  %v1946_v20 = vadd.f32 %v1924_v32, %v1886_v17  ;;  %v2003_v23 = vadd.f32 %v1981_v19, %v1886_v17 }
 0x510   : > { %v2059_v24 = vadd.f32 %v2037_v46, %v1886_v17  ;;  %v2076_v25 = vmax.f32 %v2068_v38, 0.0 }
 0x511   : > { %v2084_v29 = vmax.f32 %v1964_v18, %v2020_v35  ;;  %v1955_v40 = vadd.f32 %v3878_v7, %v1946_v20  ;;  %v2011_v27 = vadd.f32 %v2003_v23, %v3878_v7 }
 0x512   : > { %v2067_v30 = vadd.f32 %v2059_v24, %v3878_v7  ;;  %v1892_v42 = vpop.xlane.xlu1 %1891  ;;  %v1895_v37 = vpop.xlane.xlu0 %1894 }
 0x513   : > { %v2092_v8 = vmax.f32 %v2084_v29, %v2076_v25  ;;  %v1963_v52 = vmax.f32 %v1955_v40, 0.0  ;;  %v1948_v2 = vadd.f32 %v1930_v44, %v1892_v42  ;;  %v2005_v9 = vadd.f32 %v1987_v60, %v1892_v42 }
 0x514   : > { %v2019_v51 = vmax.f32 %v2011_v27, 0.0  ;;  %v2075_v11 = vmax.f32 %v2067_v30, 0.0  ;;  %v2061_v14 = vadd.f32 %v2043_v36, %v1892_v42  ;;  %v1949_v32 = vadd.f32 %v1933_v63, %v1895_v37 }
 0x515   : > { %v2100_v19 = vsub.f32 %v1964_v18, %v2092_v8  ;;  %v2124_v46 = vsub.f32 %v2020_v35, %v2092_v8  ;;  %v2148_v38 = vsub.f32 %v2076_v25, %v2092_v8  ;;  %v1957_v17 = vadd.f32 %v3878_v7, %v1948_v2 }
 0x516   : > { %v2083_v20 = vmax.f32 %v1963_v52, %v2019_v51  ;;  %v2013_v23 = vadd.f32 %v2005_v9, %v3878_v7  ;;  %v2069_v24 = vadd.f32 %v2061_v14, %v3878_v7  ;;  %v1958_v43 = vadd.f32 %v3878_v7, %v1949_v32  ;;  %v1898_v42 = vpop.xlane.xlu1 %1897 }
 0x517   : > { %v2109_v29 = vmul.f32 1.442695, %v2100_v19  ;;  %v2133_v40 = vmul.f32 1.442695, %v2124_v46  ;;  %v2157_v44 = vmul.f32 1.442695, %v2148_v38  ;;  %v2006_v60 = vadd.f32 %v1990_v53, %v1895_v37  ;;  %v1901_v53 = vpop.xlane.xlu0 %1900 }
 0x518   : > { %v2091_v27 = vmax.f32 %v2083_v20, %v2075_v11  ;;  %v1965_v30 = vmax.f32 %v1957_v17, 0.0  ;;  %v2021_v36 = vmax.f32 %v2013_v23, 0.0  ;;  %v2077_v63 = vmax.f32 %v2069_v24, 0.0 }
 0x519   : > { %3139 = vpow2.f32 %v2109_v29  ;;  %v1966_v18 = vmax.f32 %v1958_v43, 0.0  ;;  %v2014_v35 = vadd.f32 %v2006_v60, %v3878_v7  ;;  %v2062_v25 = vadd.f32 %v2046_v61, %v1895_v37 }
 0x51a   : > { %3141 = vpow2.f32 %v2133_v40  ;;  %v2099_v8 = vsub.f32 %v1963_v52, %v2091_v27  ;;  %v2123_v2 = vsub.f32 %v2019_v51, %v2091_v27  ;;  %v2147_v9 = vsub.f32 %v2075_v11, %v2091_v27 }
 0x51b   : > { %3143 = vpow2.f32 %v2157_v44  ;;  %v2085_v14 = vmax.f32 %v1965_v30, %v2021_v36  ;;  %v2022_v32 = vmax.f32 %v2014_v35, 0.0  ;;  %v2070_v19 = vadd.f32 %v2062_v25, %v3878_v7 }
 0x51c   : > { %v2107_v46 = vmul.f32 1.442695, %v2099_v8  ;;  %v2131_v38 = vmul.f32 1.442695, %v2123_v2  ;;  %v2155_v17 = vmul.f32 1.442695, %v2147_v9  ;;  %v1950_v20 = vadd.f32 %v3860_v34, %v1898_v42 }
 0x51d   : > { %v2093_v43 = vmax.f32 %v2085_v14, %v2077_v63  ;;  %v2078_v23 = vmax.f32 %v2070_v19, 0.0  ;;  %v2086_v24 = vmax.f32 %v1966_v18, %v2022_v32  ;;  %v2007_v61 = vadd.f32 %v3864_v39, %v1898_v42 }
 0x51e   : > { %3145 = vpow2.f32 %v2107_v46  ;;  %v1959_v51 = vadd.f32 %v3878_v7, %v1950_v20  ;;  %v2063_v37 = vadd.f32 %v3872_v33, %v1898_v42  ;;  %v1951_v52 = vadd.f32 %v3868_v48, %v1901_v53 }
 0x51f   : > { %3147 = vpow2.f32 %v2131_v38  ;;  %v2101_v11 = vsub.f32 %v1965_v30, %v2093_v43  ;;  %v2125_v29 = vsub.f32 %v2021_v36, %v2093_v43  ;;  %v2149_v40 = vsub.f32 %v2077_v63, %v2093_v43  ;;  %v1904_v63 = vpop.xlane.xlu1 %1903 }
 0x520   : > { %3149 = vpow2.f32 %v2155_v17  ;;  %v2094_v44 = vmax.f32 %v2086_v24, %v2078_v23  ;;  %v1967_v60 = vmax.f32 %v1959_v51, 0.0  ;;  %v2015_v34 = vadd.f32 %v2007_v61, %v3878_v7  ;;  %v1907_v17 = vpop.xlane.xlu0 %1906 }
 0x521   : > { %v2111_v27 = vmul.f32 1.442695, %v2101_v11  ;;  %v2135_v35 = vmul.f32 1.442695, %v2125_v29  ;;  %v2159_v25 = vmul.f32 1.442695, %v2149_v40  ;;  %v2071_v39 = vadd.f32 %v2063_v37, %v3878_v7 }
 0x522   : > { %v2102_v8 = vsub.f32 %v1966_v18, %v2094_v44  ;;  %v2126_v2 = vsub.f32 %v2022_v32, %v2094_v44  ;;  %v2150_v9 = vsub.f32 %v2078_v23, %v2094_v44  ;;  %v2023_v33 = vmax.f32 %v2015_v34, 0.0 }
 0x523   : > { %v3901_v42 = vpop.eup %3139  ;;  %3151 = vpow2.f32 %v2111_v27  ;;  %v2079_v48 = vmax.f32 %v2071_v39, 0.0  ;;  %v1960_v30 = vadd.f32 %v3878_v7, %v1951_v52  ;;  %v2008_v36 = vadd.f32 %v3862_v3, %v1901_v53  ;;  %v2055_v39 = vpop.xlane.xlu1 %2054 }
 0x524   : > { %v3905_v14 = vpop.eup %3141  ;;  %3153 = vpow2.f32 %v2135_v35  ;;  %v2113_v19 = vmul.f32 1.442695, %v2102_v8  ;;  %v2137_v46 = vmul.f32 1.442695, %v2126_v2  ;;  %v2161_v38 = vmul.f32 1.442695, %v2150_v9  ;;  %v2058_v8 = vpop.xlane.xlu0 %2057 }
 0x525   : > { %v3907_v18 = vpop.eup %3143  ;;  %v2172_v32 = vadd.f32 %v3905_v14, %v3901_v42  ;;  %3155 = vpow2.f32 %v2159_v25  ;;  %v2087_v20 = vmax.f32 %v1967_v60, %v2023_v33  ;;  %v1968_v43 = vmax.f32 %v1960_v30, 0.0 }
 0x526   : > { %3157 = vpow2.f32 %v2113_v19  ;;  %v2016_v23 = vadd.f32 %v2008_v36, %v3878_v7  ;;  %v2064_v3 = vadd.f32 %v3866_v56, %v1901_v53  ;;  %v1952_v24 = vadd.f32 %v3870_v4, %v1904_v63 }
 0x527   : > { %v2180_v61 = vadd.f32 %v3907_v18, %v2172_v32  ;;  %3159 = vpow2.f32 %v2137_v46  ;;  %v2095_v51 = vmax.f32 %v2087_v20, %v2079_v48  ;;  %v2009_v37 = vadd.f32 %v3876_v55, %v1904_v63 }
 0x528   : > { %v3916_v52 = vpop.eup %3145  ;;  %3161 = vpow2.f32 %v2161_v38  ;;  %v2024_v11 = vmax.f32 %v2016_v23, 0.0  ;;  %v2072_v29 = vadd.f32 %v2064_v3, %v3878_v7  ;;  %v3920_v40 = vadd.f32 %v3878_v7, %v1952_v24 }
 0x529   : > { %v3922_v44 = vpop.eup %3147  ;;  %3163 = vrcp.f32 %v2180_v61  ;;  %v2103_v56 = vsub.f32 %v1967_v60, %v2095_v51  ;;  %v2127_v4 = vsub.f32 %v2023_v33, %v2095_v51  ;;  %v2151_v53 = vsub.f32 %v2079_v48, %v2095_v51 }
 0x52a   : > { %v3924_v34 = vpop.eup %3149  ;;  %v2171_v55 = vadd.f32 %v3922_v44, %v3916_v52  ;;  %v2080_v27 = vmax.f32 %v2072_v29, 0.0  ;;  %v2088_v35 = vmax.f32 %v1968_v43, %v2024_v11  ;;  %v1969_v25 = vmax.f32 %v3920_v40, 0.0 }
 0x52b   : > { %v2115_v2 = vmul.f32 1.442695, %v2103_v56  ;;  %v2139_v9 = vmul.f32 1.442695, %v2127_v4  ;;  %v2163_v30 = vmul.f32 1.442695, %v2151_v53  ;;  %v2017_v36 = vadd.f32 %v2009_v37, %v3878_v7 }
 0x52c   : > { %v2179_v60 = vadd.f32 %v3924_v34, %v2171_v55  ;;  %v2096_v33 = vmax.f32 %v2088_v35, %v2080_v27  ;;  %v1953_v48 = vadd.f32 %v3883_v15, %v1907_v17  ;;  %v2010_v19 = vadd.f32 %v3874_v5, %v1907_v17 }
 0x52d   : > { %v3933_v46 = vpop.eup %3151  ;;  %3165 = vpow2.f32 %v2115_v2  ;;  %v2025_v38 = vmax.f32 %v2017_v36, 0.0  ;;  %v2065_v32 = vadd.f32 %v2055_v39, %v1904_v63  ;;  %v2066_v20 = vadd.f32 %v2058_v8, %v1907_v17 }
 0x52e   : > { %v3935_v23 = vpop.eup %3153  ;;  %3167 = vrcp.f32 %v2179_v60  ;;  %v2104_v3 = vsub.f32 %v1968_v43, %v2096_v33  ;;  %v2128_v24 = vsub.f32 %v2024_v11, %v2096_v33  ;;  %v2152_v61 = vsub.f32 %v2080_v27, %v2096_v33 }
 0x52f   : > { %v3937_v51 = vpop.eup %3155  ;;  %v2173_v37 = vadd.f32 %v3935_v23, %v3933_v46  ;;  %3169 = vpow2.f32 %v2139_v9  ;;  %v1962_v5 = vadd.f32 %v3878_v7, %v1953_v48  ;;  %v2018_v15 = vadd.f32 %v2010_v19, %v3878_v7 }
 0x530   : > { %v3943_v29 = vpop.eup %3157  ;;  %3171 = vpow2.f32 %v2163_v30  ;;  %v2117_v63 = vmul.f32 1.442695, %v2104_v3  ;;  %v2141_v17 = vmul.f32 1.442695, %v2128_v24  ;;  %v2165_v11 = vmul.f32 1.442695, %v2152_v61 }
 0x531   : > { %v3945_v40 = vpop.eup %3159  ;;  %v2181_v43 = vadd.f32 %v3937_v51, %v2173_v37  ;;  %v1970_v56 = vmax.f32 %v1962_v5, 0.0  ;;  %v2026_v4 = vmax.f32 %v2018_v15, 0.0  ;;  %v2073_v27 = vadd.f32 %v2065_v32, %v3878_v7 }
 0x532   : > { %v3948_v53 = vpop.eup %3161  ;;  %v2174_v55 = vadd.f32 %v3945_v40, %v3943_v29  ;;  %3173 = vpow2.f32 %v2117_v63  ;;  %v2074_v35 = vadd.f32 %v2066_v20, %v3878_v7  ;;  %v2089_v8 = vmax.f32 %v1969_v25, %v2025_v38 }
 0x533   : > { %v3164_v39 = vpop.eup %3163  ;;  %3175 = vrcp.f32 %v2181_v43  ;;  %v2090_v2 = vmax.f32 %v1970_v56, %v2026_v4  ;;  %v2081_v30 = vmax.f32 %v2073_v27, 0.0  ;;  %v2276_v27 = vpop.permute.xlu1 %2275 }
 0x534   : > { %v2182_v9 = vadd.f32 %v3948_v53, %v2174_v55  ;;  %3177 = vpow2.f32 %v2141_v17  ;;  %v2082_v36 = vmax.f32 %v2074_v35, 0.0  ;;  %v2196_v60 = vmul.f32 %v3164_v39, %v3901_v42 }
 0x535   : > { %3179 = vpow2.f32 %v2165_v11  ;;  %v2212_v33 = vmul.f32 %v3164_v39, %v3905_v14  ;;  %v2097_v48 = vmax.f32 %v2089_v8, %v2081_v30  ;;  %v2236_v3 = vmul.f32 %v3164_v39, %v3907_v18 }
 0x536   : > { %3181 = vrcp.f32 %v2182_v9  ;;  %v2098_v19 = vmax.f32 %v2090_v2, %v2082_v36  ;;  %v2204_v7 = vmul.f32 %v2196_v60, %v3692_v62 }
 0x537   : > { %v3957_v32 = vpop.eup %3165  ;;  %v2220_v20 = vmul.f32 %v2212_v33, %v3562_v58  ;;  %v2105_v61 = vsub.f32 %v1969_v25, %v2097_v48  ;;  %v2129_v37 = vsub.f32 %v2025_v38, %v2097_v48  ;;  %v2153_v5 = vsub.f32 %v2081_v30, %v2097_v48 }
 0x538   : > { %v3168_v24 = vpop.eup %3167  ;;  %v2106_v15 = vsub.f32 %v1970_v56, %v2098_v19  ;;  %v2130_v42 = vsub.f32 %v2026_v4, %v2098_v19  ;;  %v2154_v14 = vsub.f32 %v2082_v36, %v2098_v19  ;;  %v2244_v56 = vmul.f32 %v2236_v3, %v3635_v28 }
 0x539   : > { %v3962_v63 = vpop.eup %3169  ;;  %v2228_v17 = vadd.f32 %v2220_v20, %v2204_v7  ;;  %v2195_v43 = vmul.f32 %v3168_v24, %v3916_v52  ;;  %v2119_v58 = vmul.f32 1.442695, %v2105_v61  ;;  %v2143_v55 = vmul.f32 1.442695, %v2129_v37  ;;  %v2278_v61 = vpop.permute.xlu0 %2277 }
 0x53a   : > { %v3965_v11 = vpop.eup %3171  ;;  %v2175_v62 = vadd.f32 %v3962_v63, %v3957_v32  ;;  %v2167_v18 = vmul.f32 1.442695, %v2153_v5  ;;  %v2121_v25 = vmul.f32 1.442695, %v2106_v15  ;;  %v2145_v38 = vmul.f32 1.442695, %v2130_v42 }
 0x53b   : > { %3183 = vpow2.f32 %v2119_v58  ;;  %v2203_v52 = vmul.f32 %v2195_v43, %v3681_v57  ;;  %v2211_v39 = vmul.f32 %v3168_v24, %v3922_v44  ;;  %v2169_v2 = vmul.f32 1.442695, %v2154_v14 }
 0x53c   : > { %v3970_v35 = vpop.eup %3173  ;;  %v2183_v4 = vadd.f32 %v3965_v11, %v2175_v62  ;;  %3185 = vpow2.f32 %v2143_v55  ;;  %v2252_v9 = vadd.f32 %v2244_v56, %v2228_v17  ;;  %v2235_v30 = vmul.f32 %v3168_v24, %v3924_v34 }
 0x53d   : > { %v3176_v8 = vpop.eup %3175  ;;  %v2219_v28 = vmul.f32 %v2211_v39, %v3573_v0 }
 0x53e   : > { %v3976_v36 = vpop.eup %3177  ;;  %3187 = vrcp.f32 %v2183_v4  ;;  %v2197_v60 = vmul.f32 %v3176_v8, %v3933_v46  ;;  %v2213_v33 = vmul.f32 %v3176_v8, %v3935_v23  ;;  %v2243_v44 = vmul.f32 %v2235_v30, %v3638_v31  ;;  %v2280_v23 = vpop.permute.xlu1 %2279 }
 0x53f   : > { %v3180_v48 = vpop.eup %3179  ;;  %v2176_v57 = vadd.f32 %v3976_v36, %v3970_v35  ;;  %3189 = vpow2.f32 %v2167_v18  ;;  %v2237_v19 = vmul.f32 %v3176_v8, %v3937_v51  ;;  %v2227_v34 = vadd.f32 %v2219_v28, %v2203_v52 }
 0x540   : > { %v3182_v7 = vpop.eup %3181  ;;  %3191 = vpow2.f32 %v2121_v25  ;;  %v2205_v20 = vmul.f32 %v2197_v60, %v3685_v59  ;;  %v2221_v0 = vmul.f32 %v2213_v33, %v3601_v12 }
 0x541   : > { %v2184_v3 = vadd.f32 %v3180_v48, %v2176_v57  ;;  %3193 = vpow2.f32 %v2145_v38  ;;  %v2245_v46 = vmul.f32 %v2237_v19, %v3640_v41  ;;  %v2198_v24 = vmul.f32 %v3182_v7, %v3943_v29 }
 0x542   : > { %3195 = vpow2.f32 %v2169_v2  ;;  %v2251_v37 = vadd.f32 %v2243_v44, %v2227_v34  ;;  %v2229_v31 = vadd.f32 %v2221_v0, %v2205_v20  ;;  %v2214_v51 = vmul.f32 %v3182_v7, %v3945_v40  ;;  %v2282_v43 = vpop.permute.xlu1 %2281 }
 0x543   : > { %3197 = vrcp.f32 %v2184_v3  ;;  %v2206_v5 = vmul.f32 %v2198_v24, %v3717_v10  ;;  %v2238_v59 = vmul.f32 %v3182_v7, %v3948_v53  ;;  %v2300_v41 = vsel %vm815_vm1, %v2252_v9, %v2278_v61 }
 0x544   : > { %v2299_v12 = vsel %vm815_vm1, %v2251_v37, %v2276_v27  ;;  %v2253_v15 = vadd.f32 %v2245_v46, %v2229_v31  ;;  %v2222_v42 = vmul.f32 %v2214_v51, %v3576_v1  ;;  %v4066_v51 = vld [vmem:[#allocation6_spill] sm:$0xff] }
 0x545   : > { %2992 = vmatprep.mubr.msk.f32.mxu1 %vm2320_vm5, %v2299_v12  ;;  %v3184_v29 = vpop.eup %3183  ;;  %v2246_v17 = vmul.f32 %v2238_v59, %v3652_v47 }
 0x546   : > { %v2301_v14 = vsel %vm815_vm1, %v2253_v15, %v2280_v23  ;;  %2993 = vmatmul.mubr.msk.f32.vlgmr.msra.gmra.mrb[24].mxu1 %vm2320_vm5, %v2300_v41  ;;  %v2230_v40 = vadd.f32 %v2222_v42, %v2206_v5  ;;  %v3186_v10 = vpop.eup %3185  ;;  %v2694_v41 = vld [vmem:[%s4057_s12] ss:$0 sm:$0xff] }
 0x547   : > { %2995 = vmatprep.mubr.msk.f32.mxu1 %vm2320_vm5, %v2301_v14  ;;  %v2177_v62 = vadd.f32 %v3186_v10, %v3184_v29 }
 0x548   : > { %v3188_v53 = vpop.eup %3187  ;;  %v2254_v58 = vadd.f32 %v2246_v17, %v2230_v40 }
 0x549   : > { %v3190_v1 = vpop.eup %3189  ;;  %v2199_v55 = vmul.f32 %v3188_v53, %v3957_v32  ;;  %v2215_v18 = vmul.f32 %v3188_v53, %v3962_v63  ;;  %v2239_v25 = vmul.f32 %v3188_v53, %v3965_v11  ;;  %v2284_v11 = vpop.permute.xlu0 %2283 }
 0x54a   : > { %v3192_v38 = vpop.eup %3191  ;;  %v2185_v56 = vadd.f32 %v3190_v1, %v2177_v62  ;;  %v2302_v27 = vsel %vm815_vm1, %v2254_v58, %v2282_v43 }
 0x54b   : > { %v3194_v4 = vpop.eup %3193  ;;  %2996 = vmatmul.mubr.msk.f32.gmra.mrb[26].mxu1 %vm2320_vm5, %v2302_v27  ;;  %v2207_v47 = vmul.f32 %v2199_v55, %v3708_v6  ;;  %v2223_v52 = vmul.f32 %v2215_v18, %v3611_v16  ;;  %v2247_v63 = vmul.f32 %v2239_v25, %v3647_v45  ;;  %v2286_v45 = vpop.permute.xlu1 %2285 }
 0x54c   : > { %v3196_v39 = vpop.eup %3195  ;;  %3199 = vrcp.f32 %v2185_v56  ;;  %v2178_v8 = vadd.f32 %v3194_v4, %v3192_v38 }
 0x54d   : > { %v3198_v2 = vpop.eup %3197  ;;  %v2231_v32 = vadd.f32 %v2223_v52, %v2207_v47  ;;  %v2288_v61 = vpop.permute.xlu0 %2287 }
 0x54e   : > { %v2186_v9 = vadd.f32 %v3196_v39, %v2178_v8  ;;  %v2200_v30 = vmul.f32 %v3198_v2, %v3970_v35  ;;  %v2216_v28 = vmul.f32 %v3198_v2, %v3976_v36  ;;  %v2240_v60 = vmul.f32 %v3198_v2, %v3180_v48 }
 0x54f   : > { %v2255_v33 = vadd.f32 %v2247_v63, %v2231_v32 }
 0x550   : > { %3201 = vrcp.f32 %v2186_v9  ;;  %v2208_v6 = vmul.f32 %v2200_v30, %v3743_v26  ;;  %v2224_v16 = vmul.f32 %v2216_v28, %v3604_v13  ;;  %v2248_v19 = vmul.f32 %v2240_v60, %v3658_v50 }
 0x551   : > { %v2303_v57 = vsel %vm815_vm1, %v2255_v33, %v2284_v11 }
 0x552   : > { %v2232_v44 = vadd.f32 %v2224_v16, %v2208_v6  ;;  %2998 = vmatprep.mubr.msk.f32.mxu1 %vm2320_vm5, %v2303_v57 }
 0x554   : > { %v2256_v7 = vadd.f32 %v2248_v19, %v2232_v44 }
 0x556   : > { %v3200_v34 = vpop.eup %3199  ;;  %v2304_v35 = vsel %vm815_vm1, %v2256_v7, %v2286_v45 }
 0x557   : > { %2999 = vmatmul.mubr.msk.f32.gmra.mrb[28].mxu1 %vm2320_vm5, %v2304_v35  ;;  %v2201_v36 = vmul.f32 %v3200_v34, %v3184_v29  ;;  %v2217_v48 = vmul.f32 %v3200_v34, %v3186_v10  ;;  %v2241_v20 = vmul.f32 %v3200_v34, %v3190_v1 }
 0x559   : > { %v2209_v26 = vmul.f32 %v2201_v36, %v3734_v21  ;;  %v2225_v13 = vmul.f32 %v2217_v48, %v3622_v22  ;;  %v2249_v3 = vmul.f32 %v2241_v20, %v3654_v49  ;;  %v4067_v21 = vld [vmem:[#allocation7_spill] sm:$0xff]  ;;  %v2290_v22 = vpop.permute.xlu1 %2289 }
 0x55a   : > { %v3202_v0 = vpop.eup %3201 }
 0x55b   : > { %v2233_v50 = vadd.f32 %v2225_v13, %v2209_v26  ;;  %v2202_v46 = vmul.f32 %v3202_v0, %v3192_v38  ;;  %v2218_v23 = vmul.f32 %v3202_v0, %v3194_v4  ;;  %v2242_v24 = vmul.f32 %v3202_v0, %v3196_v39 }
 0x55d   : > { %v2257_v37 = vadd.f32 %v2249_v3, %v2233_v50  ;;  %v2210_v31 = vmul.f32 %v2202_v46, %v3763_v54  ;;  %v2226_v5 = vmul.f32 %v2218_v23, %v4066_v51  ;;  %v2250_v15 = vmul.f32 %v2242_v24, %v4067_v21 }
 0x55f   : > { %v2305_v59 = vsel %vm815_vm1, %v2257_v37, %v2288_v61  ;;  %v2234_v12 = vadd.f32 %v2226_v5, %v2210_v31 }
 0x560   : > { %3001 = vmatprep.mubr.msk.f32.mxu1 %vm2320_vm5, %v2305_v59 }
 0x561   : > { %v2258_v49 = vadd.f32 %v2250_v15, %v2234_v12 }
 0x563   : > { %v2306_v42 = vsel %vm815_vm1, %v2258_v49, %v2290_v22 }
 0x564   : > { %3002 = vmatmul.mubr.msk.f32.gmra.mrb[30].mxu1 %vm2320_vm5, %v2306_v42 }
 0x619   : > { %v2994_v54 = vpop.f32.mrb[24].mxu1 }
 0x61a   : > { %v2417_v29 = vadd.f32 %v2994_v54, %v2694_v41  ;;  %v2411_v14 = vpop.f32.mrb[25].mxu1 }
 0x61b   : > { %v2412_v40 = vadd.f32 %v2694_v41, %v2411_v14 }
 0x61c   : > { %2451 = vst [vmem:[%s611_s17 + $0x8] sm:$0xff] %v2417_v29 }
 0x61d   : > { %2450 = vst [vmem:[%s611_s17] sm:$0xff] %v2412_v40 }
 0x61e   : > { %v2997_v17 = vpop.f32.mrb[26].mxu1 }
 0x61f   : > { %v2427_v10 = vadd.f32 %v2997_v17, %v2694_v41  ;;  %v2421_v43 = vpop.f32.mrb[27].mxu1 }
 0x620   : > { %v2422_v53 = vadd.f32 %v2694_v41, %v2421_v43 }
 0x621   : > { %2453 = vst [vmem:[%s611_s17 + $0x18] sm:$0xff] %v2427_v10 }
 0x622   : > { %2452 = vst [vmem:[%s611_s17 + $0x10] sm:$0xff] %v2422_v53 }
 0x62a   : > { %v3000_v62 = vpop.f32.mrb[28].mxu1 }
 0x62b   : > { %v2437_v58 = vadd.f32 %v3000_v62, %v2694_v41  ;;  %v2431_v1 = vpop.f32.mrb[29].mxu1 }
 0x62c   : > { %v2432_v55 = vadd.f32 %v2694_v41, %v2431_v1 }
 0x62d   : > { %2455 = vst [vmem:[%s611_s17 + $0x28] sm:$0xff] %v2437_v58 }
 0x62e   : > { %2454 = vst [vmem:[%s611_s17 + $0x20] sm:$0xff] %v2432_v55 }
 0x637   : > { %v3003_v18 = vpop.f32.mrb[30].mxu1 }
 0x638   : > { %v2447_v25 = vadd.f32 %v3003_v18, %v2694_v41  ;;  %v2441_v38 = vpop.f32.mrb[31].mxu1 }
 0x639   : > { %v2442_v56 = vadd.f32 %v2694_v41, %v2441_v38 }
 0x63a   : > { %2457 = vst [vmem:[%s611_s17 + $0x38] sm:$0xff] %v2447_v25 }
 0x63b   : > { %2456 = vst [vmem:[%s611_s17 + $0x30] sm:$0xff] %v2442_v56 }
 0x63c PF: > { %p21_p6 = scmp.ge.s32.totalorder %s3336_s29, 4   ;;  %s4068_s25 = smov %s3240_s26 }
 0x63d   : > { %s4069_s26 = smov %s3346_s15  ;;  %s4070_s27 = smov %s3336_s29 }
 0x63e   :  { %23 = sbr.rel (!%p21_p6) target bundleno = 2 (0x2), region = 162 }
 0x645   :  { %2480 = vsyncpa [#allocation3], 1 }
 0x646   :  { %2482 = vsyncpa [#allocation3 + $0x1], 1 }

</bundles_post_ra>
